<compile_context>
chip_gen: v7x
topology: tpu7x:2x2x1
jax: 0.10.0
libtpu: 0.0.40
codegen_flags: <defaults>
</compile_context>

<pallas_src>
import functools

import jax
import jax.numpy as jnp
from jax.experimental import pallas as pl
from jax.experimental.pallas import tpu as pltpu

LANE = 128


def _round_up(x, m):
    return (x + m - 1) // m * m


def _cdiv(a, b):
    return (a + b - 1) // b


_VMEM = pl.BlockSpec(memory_space=pltpu.MemorySpace.VMEM)
_SMEM = pl.BlockSpec(memory_space=pltpu.MemorySpace.SMEM)

_PARALLEL_PARAMS = pltpu.CompilerParams(
    dimension_semantics=("parallel",), vmem_limit_bytes=32 * 1024 * 1024)
_ARBITRARY_PARAMS = pltpu.CompilerParams(
    dimension_semantics=("arbitrary",), vmem_limit_bytes=32 * 1024 * 1024)


# ----------------------------- Pallas kernels ------------------------------

def _mm_bias_act_kernel(p_ref, w_ref, b_ref, o_ref, *, neg_slope):
    # (TM, Kp) bf16 x (Kp, Coutp) bf16 on the MXU -> f32; bias + LeakyReLU on the VPU.
    y = jnp.dot(p_ref[...], w_ref[...], preferred_element_type=jnp.float32)
    y = y + b_ref[...]
    if neg_slope is not None:
        y = jnp.where(y >= 0.0, y, neg_slope * y)
    o_ref[...] = y


def _sqdiff_acc_kernel(a_ref, b_ref, o_ref):
    # Gridded squared-difference accumulation into a resident VMEM output block.
    @pl.when(pl.program_id(0) == 0)
    def _():
        o_ref[...] = jnp.zeros_like(o_ref)
    d = a_ref[...] - b_ref[...]
    o_ref[...] += d * d


def _logit_hinge_kernel(x_ref, mr_ref, mf_ref, o_ref):
    # One call computes every logit statistic needed (real/fake selected via masks):
    # o[0]=sum(x*mr), o[1]=sum(relu(1-x)*mr), o[2]=sum(x*mf), o[3]=sum(relu(1+x)*mf)
    x = x_ref[...]
    mr = mr_ref[...]
    mf = mf_ref[...]
    o_ref[0] = jnp.sum(x * mr)
    o_ref[1] = jnp.sum(jnp.maximum(1.0 - x, 0.0) * mr)
    o_ref[2] = jnp.sum(x * mf)
    o_ref[3] = jnp.sum(jnp.maximum(1.0 + x, 0.0) * mf)


# ----------------------------- kernel wrappers ------------------------------

def matmul_bias_act_pallas(patches, w2d_p, b_p, neg_slope, row_tile=512):
    """(P, K) bf16 patches x (Kp, Coutp) bf16 weights, gridded over row tiles."""
    P, K = patches.shape
    Kp, Coutp = w2d_p.shape
    tm = min(row_tile, _round_up(P, 16))     # bf16-friendly sublane multiple
    Pp = _round_up(P, tm)
    patches = jnp.pad(patches, ((0, Pp - P), (0, Kp - K)))
    kern = functools.partial(_mm_bias_act_kernel, neg_slope=neg_slope)
    out = pl.pallas_call(
        kern,
        out_shape=jax.ShapeDtypeStruct((Pp, Coutp), jnp.float32),
        grid=(Pp // tm,),
        in_specs=[pl.BlockSpec((tm, Kp), lambda i: (i, 0)),
                  pl.BlockSpec((Kp, Coutp), lambda i: (0, 0)),
                  pl.BlockSpec((1, Coutp), lambda i: (0, 0))],
        out_specs=pl.BlockSpec((tm, Coutp), lambda i: (i, 0)),
        compiler_params=_PARALLEL_PARAMS,
    )(patches, w2d_p, b_p)
    return out[:P]


def conv2d_pallas(x_nhwc, layer, neg_slope):
    """Conv2d via im2col (JAX glue) + gridded Pallas matmul/bias/LeakyReLU kernel."""
    N, H, W, C = x_nhwc.shape
    kh, kw = layer["kh"], layer["kw"]
    stride, pad = layer["stride"], layer["pad"]
    cin, cout = layer["cin"], layer["cout"]
    assert C == cin
    xp = jnp.pad(x_nhwc, ((0, 0), (pad, pad), (pad, pad), (0, 0)))
    Ho = (H + 2 * pad - kh) // stride + 1
    Wo = (W + 2 * pad - kw) // stride + 1
    cols = []
    for i in range(kh):
        for j in range(kw):
            cols.append(xp[:, i:i + (Ho - 1) * stride + 1:stride,
                           j:j + (Wo - 1) * stride + 1:stride, :])  # (N,Ho,Wo,C)
    patches = jnp.stack(cols, axis=3)              # (N,Ho,Wo,KH*KW,C)
    patches = jnp.moveaxis(patches, 3, 4)          # (N,Ho,Wo,C,KH*KW) -> Cin-major flatten
    patches = patches.reshape(N * Ho * Wo, cin * kh * kw).astype(jnp.bfloat16)
    out = matmul_bias_act_pallas(patches, layer["w2d"], layer["b"], neg_slope)
    return out[:, :cout].reshape(N, Ho, Wo, cout)


def mse_pallas(a, b):
    """Mean squared error via a gridded, lane-dense (rows,128) accumulation kernel."""
    n_true = a.size
    af = a.reshape(-1).astype(jnp.float32)
    bf = b.reshape(-1).astype(jnp.float32)
    rows = _cdiv(n_true, LANE)
    tm = min(512, _round_up(rows, 8))
    rows_p = _round_up(rows, tm)
    tot = rows_p * LANE
    af = jnp.pad(af, (0, tot - n_true)).reshape(rows_p, LANE)
    bf = jnp.pad(bf, (0, tot - n_true)).reshape(rows_p, LANE)
    partial = pl.pallas_call(
        _sqdiff_acc_kernel,
        out_shape=jax.ShapeDtypeStruct((tm, LANE), jnp.float32),
        grid=(rows_p // tm,),
        in_specs=[pl.BlockSpec((tm, LANE), lambda i: (i, 0)),
                  pl.BlockSpec((tm, LANE), lambda i: (i, 0))],
        out_specs=pl.BlockSpec((tm, LANE), lambda i: (0, 0)),
        compiler_params=_ARBITRARY_PARAMS,
    )(af, bf)
    return jnp.sum(partial) / jnp.float32(n_true)


def logit_hinge_sums_pallas(logits_flat, mask_real, mask_fake):
    """Single pallas_call returning the 4 sums needed for GAN/hinge/LeCam terms."""
    n = logits_flat.shape[0]
    rows = max(8, _round_up(_cdiv(n, LANE), 8))
    tot = rows * LANE

    def prep(v):
        return jnp.pad(v.astype(jnp.float32), (0, tot - n)).reshape(rows, LANE)

    return pl.pallas_call(
        _logit_hinge_kernel,
        out_shape=jax.ShapeDtypeStruct((4,), jnp.float32),
        in_specs=[_VMEM, _VMEM, _VMEM],
        out_specs=_SMEM,
    )(prep(logits_flat), prep(mask_real), prep(mask_fake))


def compute_lecam_loss(rm, fm, ema_rm, ema_fm):
    # Scalar math: plain JAX (a dedicated pallas_call would be pure launch overhead).
    return (jnp.square(jax.nn.relu(rm - ema_fm))
            + jnp.square(jax.nn.relu(ema_rm - fm)))


# ----------------------------- sub-modules ------------------------------

def _make_conv_layer(key, cin, cout, kh, kw, stride, pad, w_std=0.02):
    """Pre-pack the conv weight as a bf16 (Kp, Coutp) matmul operand at init."""
    w = w_std * jax.random.normal(key, (cout, cin, kh, kw), jnp.float32)
    b = jnp.zeros((cout,), jnp.float32)
    K = cin * kh * kw
    Kp = _round_up(K, LANE)
    Coutp = _round_up(cout, LANE)
    w2d = w.reshape(cout, K).T                      # (K, Cout), PyTorch flatten order
    w2d_p = jnp.zeros((Kp, Coutp), jnp.bfloat16).at[:K, :cout].set(
        w2d.astype(jnp.bfloat16))
    b_p = jnp.zeros((1, Coutp), jnp.float32).at[0, :cout].set(b)
    return dict(w2d=w2d_p, b=b_p, kh=kh, kw=kw, cin=cin, cout=cout,
                stride=stride, pad=pad)


class NLayerDiscriminator:
    """PatchGAN discriminator (taming-transformers NLayerDiscriminator structure).

    # TODO(synk): BatchNorm/ActNorm layers of the original are omitted (treated as
    # eval-mode identity); weights are deterministic synthetic N(0, 0.02) init.
    """

    def __init__(self, key, input_nc=3, ndf=8, n_layers=2):
        specs = [(input_nc, ndf, 2)]
        nf_mult = 1
        for n in range(1, n_layers):
            nf_mult_prev, nf_mult = nf_mult, min(2 ** n, 8)
            specs.append((ndf * nf_mult_prev, ndf * nf_mult, 2))
        nf_mult_prev, nf_mult = nf_mult, min(2 ** n_layers, 8)
        specs.append((ndf * nf_mult_prev, ndf * nf_mult, 1))
        specs.append((ndf * nf_mult, 1, 1))
        self.layers = []
        for cin, cout, stride in specs:
            key, k = jax.random.split(key)
            self.layers.append(_make_conv_layer(k, cin, cout, 4, 4, stride, 1))

    def __call__(self, x_nhwc):
        h = x_nhwc
        n = len(self.layers)
        for li, layer in enumerate(self.layers):
            slope = 0.2 if li < n - 1 else None   # LeakyReLU(0.2) except final conv
            h = conv2d_pallas(h, layer, neg_slope=slope)
        return h  # (N, Ho, Wo, 1) patch logits


class PerceptualLoss:
    """# TODO(synk): real perceptual net (config.perceptual_loss_name, e.g. LPIPS/VGG)
    # weights unavailable; uses a fixed deterministic conv feature extractor + MSE."""

    def __init__(self, key, in_ch=3, feat_ch=8):
        self.layer = _make_conv_layer(key, in_ch, feat_ch, 3, 3, 1, 1, w_std=0.05)

    def __call__(self, x_nhwc, y_nhwc):
        both = jnp.concatenate([x_nhwc, y_nhwc], axis=0)        # one conv launch
        feats = conv2d_pallas(both, self.layer, neg_slope=0.0)  # ReLU features
        n = x_nhwc.shape[0]
        return mse_pallas(feats[:n], feats[n:])


# ----------------------------- RecLoss ------------------------------

class Config(dict):
    __getattr__ = dict.__getitem__


class RecLoss:
    def __init__(self, config, key):
        self.config = config
        self.rec_weight = config.rec_weight
        self.perceptual_weight = config.perceptual_weight
        self.discriminator_weight = config.discriminator_weight
        self.lecam_regularization_weight = config.lecam_regularization_weight
        self.discriminator_factor = config.discriminator_factor
        self.lecam_ema_decay = config.get('lecam_ema_decay', 0.999)
        self.discriminator_start_iter = config.discriminator_start_iter
        if self.lecam_regularization_weight > 0.0:
            self.ema_real_logits_mean = jnp.zeros((), jnp.float32)
            self.ema_fake_logits_mean = jnp.zeros((), jnp.float32)
        kd, kp = jax.random.split(key)
        self.discriminator = NLayerDiscriminator(kd)
        self.perceptual_loss = PerceptualLoss(kp)
        # Pure jitted forwards: device scalars out, EMA state threaded explicitly,
        # no host float() syncs inside the hot path.
        self._gen_jit = jax.jit(self._generator_impl, static_argnums=(2, 3))
        self._disc_jit = jax.jit(self._discriminator_impl, static_argnums=(2,))

    def should_discriminator_be_trained(self, global_step):
        return global_step >= self.discriminator_start_iter

    def __call__(self, inputs, reconstructions, global_step, mode='generator'):
        if mode == 'generator':
            return self._forward_generator(inputs, reconstructions, global_step)
        elif mode == 'discriminator':
            return self._forward_discriminator(inputs, reconstructions, global_step)
        raise ValueError(f'Unsupported mode {mode}')

    # ----- jitted pure implementations -----

    def _generator_impl(self, inputs, reconstructions, d_factor, use_disc):
        x = jnp.transpose(inputs, (0, 2, 3, 1))            # NCHW -> NHWC
        r = jnp.transpose(reconstructions, (0, 2, 3, 1))
        reconstruction_loss = mse_pallas(x, r)
        perceptual_loss = self.perceptual_loss(x, r)
        generator_loss = jnp.float32(0.0)
        if use_disc:
            logits_fake = self.discriminator(r)
            n = logits_fake.size
            ones = jnp.ones((n,), jnp.float32)
            sums = logit_hinge_sums_pallas(logits_fake.reshape(-1), ones, ones)
            generator_loss = -(sums[0] / jnp.float32(n))   # -mean(logits_fake)
        total_loss = (self.rec_weight * reconstruction_loss
                      + self.perceptual_weight * perceptual_loss
                      + self.discriminator_weight * d_factor * generator_loss)
        parts = dict(total_loss=total_loss,
                     reconstruction_loss=reconstruction_loss,
                     perceptual_loss=perceptual_loss,
                     gan_loss=generator_loss)
        return total_loss, parts

    def _discriminator_impl(self, inputs, reconstructions, d_factor, ema_real, ema_fake):
        x = jnp.transpose(inputs, (0, 2, 3, 1))
        r = jnp.transpose(reconstructions, (0, 2, 3, 1))
        both = jnp.concatenate([x, r], axis=0)             # real || fake in ONE pass
        logits = self.discriminator(both)                  # (2N, Ho, Wo, 1)
        n_half = logits.size // 2
        mask_real = jnp.concatenate([jnp.ones((n_half,), jnp.float32),
                                     jnp.zeros((n_half,), jnp.float32)])
        mask_fake = 1.0 - mask_real
        sums = logit_hinge_sums_pallas(logits.reshape(-1), mask_real, mask_fake)
        inv = 1.0 / jnp.float32(n_half)
        logits_real_mean = sums[0] * inv
        loss_real = sums[1] * inv                          # mean(relu(1 - logits_real))
        logits_fake_mean = sums[2] * inv
        loss_fake = sums[3] * inv                          # mean(relu(1 + logits_fake))
        hinge = 0.5 * (loss_real + loss_fake)
        discriminator_loss = d_factor * hinge
        lecam_loss = jnp.float32(0.0)
        new_ema_real, new_ema_fake = ema_real, ema_fake
        if self.lecam_regularization_weight > 0.0:
            lecam_loss = (compute_lecam_loss(logits_real_mean, logits_fake_mean,
                                             ema_real, ema_fake)
                          * self.lecam_regularization_weight)
            d = self.lecam_ema_decay
            new_ema_real = ema_real * d + logits_real_mean * (1.0 - d)
            new_ema_fake = ema_fake * d + logits_fake_mean * (1.0 - d)
        discriminator_loss = discriminator_loss + lecam_loss
        parts = dict(discriminator_loss=discriminator_loss,
                     logits_real=logits_real_mean,
                     logits_fake=logits_fake_mean,
                     lecam_loss=lecam_loss)
        return discriminator_loss, parts, new_ema_real, new_ema_fake

    # ----- host-side wrappers (logging-time float conversion only) -----

    def _forward_generator(self, inputs, reconstructions, global_step):
        d_factor = (self.discriminator_factor
                    if self.should_discriminator_be_trained(global_step) else 0.0)
        use_disc = bool(d_factor > 0.0 and self.discriminator_weight > 0.0)
        total_loss, parts = self._gen_jit(inputs, reconstructions,
                                          float(d_factor), use_disc)
        loss_dict = {k: float(v) for k, v in parts.items()}
        return total_loss, loss_dict

    def _forward_discriminator(self, inputs, reconstructions, global_step):
        d_factor = (self.discriminator_factor
                    if self.should_discriminator_be_trained(global_step) else 0.0)
        if self.lecam_regularization_weight > 0.0:
            ema_r, ema_f = self.ema_real_logits_mean, self.ema_fake_logits_mean
        else:
            ema_r = ema_f = jnp.zeros((), jnp.float32)
        loss, parts, new_er, new_ef = self._disc_jit(inputs, reconstructions,
                                                     float(d_factor), ema_r, ema_f)
        if self.lecam_regularization_weight > 0.0:
            self.ema_real_logits_mean = new_er
            self.ema_fake_logits_mean = new_ef
        loss_dict = {k: float(v) for k, v in parts.items()}
        return loss, loss_dict


# ----------------------------- demo ------------------------------

if __name__ == "__main__":
    cfg = Config(rec_weight=1.0, perceptual_weight=0.1, discriminator_weight=0.1,
                 lecam_regularization_weight=0.001, discriminator_factor=1.0,
                 discriminator_start_iter=0, lecam_ema_decay=0.999,
                 perceptual_loss_name="synthetic_conv")
    key = jax.random.PRNGKey(0)
    k1, k2, k3 = jax.random.split(key, 3)
    inputs = jax.random.normal(k1, (2, 3, 16, 16), jnp.float32)           # NCHW
    reconstructions = inputs + 0.1 * jax.random.normal(k2, (2, 3, 16, 16), jnp.float32)

    rec_loss = RecLoss(cfg, k3)
    g_loss, g_dict = rec_loss(inputs, reconstructions, global_step=10, mode='generator')
    d_loss, d_dict = rec_loss(inputs, reconstructions, global_step=10, mode='discriminator')
    jax.block_until_ready((g_loss, d_loss))
    print("KERNEL_OK")
</pallas_src>

<mosaic_0001>
module attributes {stable_mosaic.version = 11 : i64} {
  func.func @_sqdiff_acc_kernel(%arg0: i32, %arg1: memref<16x128xf32, #tpu.memory_space<vmem>>, %arg2: memref<16x128xf32, #tpu.memory_space<vmem>>, %arg3: memref<16x128xf32, #tpu.memory_space<vmem>>) attributes {dimension_semantics = [#tpu.dimension_semantics<arbitrary>], iteration_bounds = array<i64: 1>, scalar_prefetch = 0 : i64, scratch_operands = 0 : i64, tpu.core_type = #tpu.core_type<tc>, window_params = [{transform_indices = @transform_0, window_bounds = array<i64: 16, 128>}, {transform_indices = @transform_1, window_bounds = array<i64: 16, 128>}, {pipeline_mode = #tpu.pipeline_mode<synchronous>, transform_indices = @transform_2, window_bounds = array<i64: 16, 128>}]} {
    %c0_i32 = arith.constant 0 : i32
    %0 = arith.cmpi eq, %arg0, %c0_i32 : i32
    %1 = arith.extui %0 : i1 to i32
    %c0_i32_0 = arith.constant 0 : i32
    %2 = arith.cmpi ne, %1, %c0_i32_0 : i32
    scf.if %2 {
      %cst = arith.constant 0.000000e+00 : f32
      %10 = vector.broadcast %cst : f32 to vector<16x128xf32>
      %c0_8 = arith.constant 0 : index
      %c0_9 = arith.constant 0 : index
      %11 = vector.load %arg3[%c0_8, %c0_9] : memref<16x128xf32, #tpu.memory_space<vmem>>, vector<16x128xf32>
      tpu.vector_store %arg3[%c0_8, %c0_9], %10 {strides = array<i32>} : memref<16x128xf32, #tpu.memory_space<vmem>>, vector<16x128xf32>,
    } else {
    }
    %c0 = arith.constant 0 : index
    %c0_1 = arith.constant 0 : index
    %3 = vector.load %arg1[%c0, %c0_1] : memref<16x128xf32, #tpu.memory_space<vmem>>, vector<16x128xf32>
    %c0_2 = arith.constant 0 : index
    %c0_3 = arith.constant 0 : index
    %4 = vector.load %arg2[%c0_2, %c0_3] : memref<16x128xf32, #tpu.memory_space<vmem>>, vector<16x128xf32>
    %5 = arith.subf %3, %4 : vector<16x128xf32>
    %c0_4 = arith.constant 0 : index
    %c0_5 = arith.constant 0 : index
    %6 = vector.load %arg3[%c0_4, %c0_5] : memref<16x128xf32, #tpu.memory_space<vmem>>, vector<16x128xf32>
    %7 = arith.mulf %5, %5 : vector<16x128xf32>
    %8 = arith.addf %6, %7 : vector<16x128xf32>
    %c0_6 = arith.constant 0 : index
    %c0_7 = arith.constant 0 : index
    %9 = vector.load %arg3[%c0_6, %c0_7] : memref<16x128xf32, #tpu.memory_space<vmem>>, vector<16x128xf32>
    tpu.vector_store %arg3[%c0_6, %c0_7], %8 {strides = array<i32>} : memref<16x128xf32, #tpu.memory_space<vmem>>, vector<16x128xf32>,
    return
  }
  func.func @transform_0(%arg0: i32) -> (i32, i32) {
    %c0_i32 = arith.constant 0 : i32
    %c0_i32_0 = arith.constant 0 : i32
    return %arg0, %c0_i32 : i32, i32
  }
  func.func @transform_1(%arg0: i32) -> (i32, i32) {
    %c0_i32 = arith.constant 0 : i32
    %c0_i32_0 = arith.constant 0 : i32
    return %arg0, %c0_i32 : i32, i32
  }
  func.func @transform_2(%arg0: i32) -> (i32, i32) {
    %c0_i32 = arith.constant 0 : i32
    %c0_i32_0 = arith.constant 0 : i32
    %c0_i32_1 = arith.constant 0 : i32
    return %c0_i32, %c0_i32_0 : i32, i32
  }
}

module attributes {stable_mosaic.version = 11 : i64} {
  func.func @_mm_bias_act_kernel(%arg0: i32, %arg1: memref<512x128xbf16, #tpu.memory_space<vmem>>, %arg2: memref<128x128xbf16, #tpu.memory_space<vmem>>, %arg3: memref<1x128xf32, #tpu.memory_space<vmem>>, %arg4: memref<512x128xf32, #tpu.memory_space<vmem>>) attributes {dimension_semantics = [#tpu.dimension_semantics<parallel>], iteration_bounds = array<i64: 2>, scalar_prefetch = 0 : i64, scratch_operands = 0 : i64, tpu.core_type = #tpu.core_type<tc>, window_params = [{transform_indices = @transform_0, window_bounds = array<i64: 512, 128>}, {pipeline_mode = #tpu.pipeline_mode<synchronous>, transform_indices = @transform_1, window_bounds = array<i64: 128, 128>}, {pipeline_mode = #tpu.pipeline_mode<synchronous>, transform_indices = @transform_2, window_bounds = array<i64: 1, 128>}, {transform_indices = @transform_3, window_bounds = array<i64: 512, 128>}]} {
    %c0 = arith.constant 0 : index
    %c0_0 = arith.constant 0 : index
    %0 = vector.load %arg1[%c0, %c0_0] : memref<512x128xbf16, #tpu.memory_space<vmem>>, vector<512x128xbf16>
    %c0_1 = arith.constant 0 : index
    %c0_2 = arith.constant 0 : index
    %1 = vector.load %arg2[%c0_1, %c0_2] : memref<128x128xbf16, #tpu.memory_space<vmem>>, vector<128x128xbf16>
    %cst = arith.constant dense<0.000000e+00> : vector<512x128xf32>
    %2 = tpu.matmul %0, %1, %cst {dimension_numbers = #tpu.dot_dimension_numbers<[1], [0], [0], [1], [0, 0, 1, 1], [], []>} : vector<512x128xbf16>, vector<128x128xbf16>, vector<512x128xf32> -> vector<512x128xf32>
    %c0_3 = arith.constant 0 : index
    %c0_4 = arith.constant 0 : index
    %3 = vector.load %arg3[%c0_3, %c0_4] : memref<1x128xf32, #tpu.memory_space<vmem>>, vector<1x128xf32>
    %4 = vector.broadcast %3 : vector<1x128xf32> to vector<512x128xf32>
    %5 = arith.addf %2, %4 : vector<512x128xf32>
    %cst_5 = arith.constant 0.000000e+00 : f32
    %6 = vector.broadcast %cst_5 : f32 to vector<512x128xf32>
    %7 = arith.cmpf oge, %5, %6 : vector<512x128xf32>
    %cst_6 = arith.constant 0.000000e+00 : f32
    %8 = vector.broadcast %cst_6 : f32 to vector<512x128xf32>
    %9 = arith.mulf %8, %5 : vector<512x128xf32>
    %10 = arith.select %7, %5, %9 : vector<512x128xi1>, vector<512x128xf32>
    %c0_7 = arith.constant 0 : index
    %c0_8 = arith.constant 0 : index
    %11 = vector.load %arg4[%c0_7, %c0_8] : memref<512x128xf32, #tpu.memory_space<vmem>>, vector<512x128xf32>
    tpu.vector_store %arg4[%c0_7, %c0_8], %10 {strides = array<i32>} : memref<512x128xf32, #tpu.memory_space<vmem>>, vector<512x128xf32>,
    return
  }
  func.func @transform_0(%arg0: i32) -> (i32, i32) {
    %c0_i32 = arith.constant 0 : i32
    %c0_i32_0 = arith.constant 0 : i32
    return %arg0, %c0_i32 : i32, i32
  }
  func.func @transform_1(%arg0: i32) -> (i32, i32) {
    %c0_i32 = arith.constant 0 : i32
    %c0_i32_0 = arith.constant 0 : i32
    %c0_i32_1 = arith.constant 0 : i32
    return %c0_i32, %c0_i32_0 : i32, i32
  }
  func.func @transform_2(%arg0: i32) -> (i32, i32) {
    %c0_i32 = arith.constant 0 : i32
    %c0_i32_0 = arith.constant 0 : i32
    %c0_i32_1 = arith.constant 0 : i32
    return %c0_i32, %c0_i32_0 : i32, i32
  }
  func.func @transform_3(%arg0: i32) -> (i32, i32) {
    %c0_i32 = arith.constant 0 : i32
    %c0_i32_0 = arith.constant 0 : i32
    return %arg0, %c0_i32 : i32, i32
  }
}

module attributes {stable_mosaic.version = 11 : i64} {
  func.func @_sqdiff_acc_kernel(%arg0: i32, %arg1: memref<32x128xf32, #tpu.memory_space<vmem>>, %arg2: memref<32x128xf32, #tpu.memory_space<vmem>>, %arg3: memref<32x128xf32, #tpu.memory_space<vmem>>) attributes {dimension_semantics = [#tpu.dimension_semantics<arbitrary>], iteration_bounds = array<i64: 1>, scalar_prefetch = 0 : i64, scratch_operands = 0 : i64, tpu.core_type = #tpu.core_type<tc>, window_params = [{transform_indices = @transform_0, window_bounds = array<i64: 32, 128>}, {transform_indices = @transform_1, window_bounds = array<i64: 32, 128>}, {pipeline_mode = #tpu.pipeline_mode<synchronous>, transform_indices = @transform_2, window_bounds = array<i64: 32, 128>}]} {
    %c0_i32 = arith.constant 0 : i32
    %0 = arith.cmpi eq, %arg0, %c0_i32 : i32
    %1 = arith.extui %0 : i1 to i32
    %c0_i32_0 = arith.constant 0 : i32
    %2 = arith.cmpi ne, %1, %c0_i32_0 : i32
    scf.if %2 {
      %cst = arith.constant 0.000000e+00 : f32
      %10 = vector.broadcast %cst : f32 to vector<32x128xf32>
      %c0_8 = arith.constant 0 : index
      %c0_9 = arith.constant 0 : index
      %11 = vector.load %arg3[%c0_8, %c0_9] : memref<32x128xf32, #tpu.memory_space<vmem>>, vector<32x128xf32>
      tpu.vector_store %arg3[%c0_8, %c0_9], %10 {strides = array<i32>} : memref<32x128xf32, #tpu.memory_space<vmem>>, vector<32x128xf32>,
    } else {
    }
    %c0 = arith.constant 0 : index
    %c0_1 = arith.constant 0 : index
    %3 = vector.load %arg1[%c0, %c0_1] : memref<32x128xf32, #tpu.memory_space<vmem>>, vector<32x128xf32>
    %c0_2 = arith.constant 0 : index
    %c0_3 = arith.constant 0 : index
    %4 = vector.load %arg2[%c0_2, %c0_3] : memref<32x128xf32, #tpu.memory_space<vmem>>, vector<32x128xf32>
    %5 = arith.subf %3, %4 : vector<32x128xf32>
    %c0_4 = arith.constant 0 : index
    %c0_5 = arith.constant 0 : index
    %6 = vector.load %arg3[%c0_4, %c0_5] : memref<32x128xf32, #tpu.memory_space<vmem>>, vector<32x128xf32>
    %7 = arith.mulf %5, %5 : vector<32x128xf32>
    %8 = arith.addf %6, %7 : vector<32x128xf32>
    %c0_6 = arith.constant 0 : index
    %c0_7 = arith.constant 0 : index
    %9 = vector.load %arg3[%c0_6, %c0_7] : memref<32x128xf32, #tpu.memory_space<vmem>>, vector<32x128xf32>
    tpu.vector_store %arg3[%c0_6, %c0_7], %8 {strides = array<i32>} : memref<32x128xf32, #tpu.memory_space<vmem>>, vector<32x128xf32>,
    return
  }
  func.func @transform_0(%arg0: i32) -> (i32, i32) {
    %c0_i32 = arith.constant 0 : i32
    %c0_i32_0 = arith.constant 0 : i32
    return %arg0, %c0_i32 : i32, i32
  }
  func.func @transform_1(%arg0: i32) -> (i32, i32) {
    %c0_i32 = arith.constant 0 : i32
    %c0_i32_0 = arith.constant 0 : i32
    return %arg0, %c0_i32 : i32, i32
  }
  func.func @transform_2(%arg0: i32) -> (i32, i32) {
    %c0_i32 = arith.constant 0 : i32
    %c0_i32_0 = arith.constant 0 : i32
    %c0_i32_1 = arith.constant 0 : i32
    return %c0_i32, %c0_i32_0 : i32, i32
  }
}

module attributes {stable_mosaic.version = 11 : i64} {
  func.func @_mm_bias_act_kernel(%arg0: i32, %arg1: memref<128x128xbf16, #tpu.memory_space<vmem>>, %arg2: memref<128x128xbf16, #tpu.memory_space<vmem>>, %arg3: memref<1x128xf32, #tpu.memory_space<vmem>>, %arg4: memref<128x128xf32, #tpu.memory_space<vmem>>) attributes {dimension_semantics = [#tpu.dimension_semantics<parallel>], iteration_bounds = array<i64: 1>, scalar_prefetch = 0 : i64, scratch_operands = 0 : i64, tpu.core_type = #tpu.core_type<tc>, window_params = [{transform_indices = @transform_0, window_bounds = array<i64: 128, 128>}, {pipeline_mode = #tpu.pipeline_mode<synchronous>, transform_indices = @transform_1, window_bounds = array<i64: 128, 128>}, {pipeline_mode = #tpu.pipeline_mode<synchronous>, transform_indices = @transform_2, window_bounds = array<i64: 1, 128>}, {transform_indices = @transform_3, window_bounds = array<i64: 128, 128>}]} {
    %c0 = arith.constant 0 : index
    %c0_0 = arith.constant 0 : index
    %0 = vector.load %arg1[%c0, %c0_0] : memref<128x128xbf16, #tpu.memory_space<vmem>>, vector<128x128xbf16>
    %c0_1 = arith.constant 0 : index
    %c0_2 = arith.constant 0 : index
    %1 = vector.load %arg2[%c0_1, %c0_2] : memref<128x128xbf16, #tpu.memory_space<vmem>>, vector<128x128xbf16>
    %cst = arith.constant dense<0.000000e+00> : vector<128x128xf32>
    %2 = tpu.matmul %0, %1, %cst {dimension_numbers = #tpu.dot_dimension_numbers<[1], [0], [0], [1], [0, 0, 1, 1], [], []>} : vector<128x128xbf16>, vector<128x128xbf16>, vector<128x128xf32> -> vector<128x128xf32>
    %c0_3 = arith.constant 0 : index
    %c0_4 = arith.constant 0 : index
    %3 = vector.load %arg3[%c0_3, %c0_4] : memref<1x128xf32, #tpu.memory_space<vmem>>, vector<1x128xf32>
    %4 = vector.broadcast %3 : vector<1x128xf32> to vector<128x128xf32>
    %5 = arith.addf %2, %4 : vector<128x128xf32>
    %cst_5 = arith.constant 0.000000e+00 : f32
    %6 = vector.broadcast %cst_5 : f32 to vector<128x128xf32>
    %7 = arith.cmpf oge, %5, %6 : vector<128x128xf32>
    %cst_6 = arith.constant 2.000000e-01 : f32
    %8 = vector.broadcast %cst_6 : f32 to vector<128x128xf32>
    %9 = arith.mulf %8, %5 : vector<128x128xf32>
    %10 = arith.select %7, %5, %9 : vector<128x128xi1>, vector<128x128xf32>
    %c0_7 = arith.constant 0 : index
    %c0_8 = arith.constant 0 : index
    %11 = vector.load %arg4[%c0_7, %c0_8] : memref<128x128xf32, #tpu.memory_space<vmem>>, vector<128x128xf32>
    tpu.vector_store %arg4[%c0_7, %c0_8], %10 {strides = array<i32>} : memref<128x128xf32, #tpu.memory_space<vmem>>, vector<128x128xf32>,
    return
  }
  func.func @transform_0(%arg0: i32) -> (i32, i32) {
    %c0_i32 = arith.constant 0 : i32
    %c0_i32_0 = arith.constant 0 : i32
    return %arg0, %c0_i32 : i32, i32
  }
  func.func @transform_1(%arg0: i32) -> (i32, i32) {
    %c0_i32 = arith.constant 0 : i32
    %c0_i32_0 = arith.constant 0 : i32
    %c0_i32_1 = arith.constant 0 : i32
    return %c0_i32, %c0_i32_0 : i32, i32
  }
  func.func @transform_2(%arg0: i32) -> (i32, i32) {
    %c0_i32 = arith.constant 0 : i32
    %c0_i32_0 = arith.constant 0 : i32
    %c0_i32_1 = arith.constant 0 : i32
    return %c0_i32, %c0_i32_0 : i32, i32
  }
  func.func @transform_3(%arg0: i32) -> (i32, i32) {
    %c0_i32 = arith.constant 0 : i32
    %c0_i32_0 = arith.constant 0 : i32
    return %arg0, %c0_i32 : i32, i32
  }
}

module attributes {stable_mosaic.version = 11 : i64} {
  func.func @_mm_bias_act_kernel(%arg0: i32, %arg1: memref<32x128xbf16, #tpu.memory_space<vmem>>, %arg2: memref<128x128xbf16, #tpu.memory_space<vmem>>, %arg3: memref<1x128xf32, #tpu.memory_space<vmem>>, %arg4: memref<32x128xf32, #tpu.memory_space<vmem>>) attributes {dimension_semantics = [#tpu.dimension_semantics<parallel>], iteration_bounds = array<i64: 1>, scalar_prefetch = 0 : i64, scratch_operands = 0 : i64, tpu.core_type = #tpu.core_type<tc>, window_params = [{transform_indices = @transform_0, window_bounds = array<i64: 32, 128>}, {pipeline_mode = #tpu.pipeline_mode<synchronous>, transform_indices = @transform_1, window_bounds = array<i64: 128, 128>}, {pipeline_mode = #tpu.pipeline_mode<synchronous>, transform_indices = @transform_2, window_bounds = array<i64: 1, 128>}, {transform_indices = @transform_3, window_bounds = array<i64: 32, 128>}]} {
    %c0 = arith.constant 0 : index
    %c0_0 = arith.constant 0 : index
    %0 = vector.load %arg1[%c0, %c0_0] : memref<32x128xbf16, #tpu.memory_space<vmem>>, vector<32x128xbf16>
    %c0_1 = arith.constant 0 : index
    %c0_2 = arith.constant 0 : index
    %1 = vector.load %arg2[%c0_1, %c0_2] : memref<128x128xbf16, #tpu.memory_space<vmem>>, vector<128x128xbf16>
    %cst = arith.constant dense<0.000000e+00> : vector<32x128xf32>
    %2 = tpu.matmul %0, %1, %cst {dimension_numbers = #tpu.dot_dimension_numbers<[1], [0], [0], [1], [0, 0, 1, 1], [], []>} : vector<32x128xbf16>, vector<128x128xbf16>, vector<32x128xf32> -> vector<32x128xf32>
    %c0_3 = arith.constant 0 : index
    %c0_4 = arith.constant 0 : index
    %3 = vector.load %arg3[%c0_3, %c0_4] : memref<1x128xf32, #tpu.memory_space<vmem>>, vector<1x128xf32>
    %4 = vector.broadcast %3 : vector<1x128xf32> to vector<32x128xf32>
    %5 = arith.addf %2, %4 : vector<32x128xf32>
    %cst_5 = arith.constant 0.000000e+00 : f32
    %6 = vector.broadcast %cst_5 : f32 to vector<32x128xf32>
    %7 = arith.cmpf oge, %5, %6 : vector<32x128xf32>
    %cst_6 = arith.constant 2.000000e-01 : f32
    %8 = vector.broadcast %cst_6 : f32 to vector<32x128xf32>
    %9 = arith.mulf %8, %5 : vector<32x128xf32>
    %10 = arith.select %7, %5, %9 : vector<32x128xi1>, vector<32x128xf32>
    %c0_7 = arith.constant 0 : index
    %c0_8 = arith.constant 0 : index
    %11 = vector.load %arg4[%c0_7, %c0_8] : memref<32x128xf32, #tpu.memory_space<vmem>>, vector<32x128xf32>
    tpu.vector_store %arg4[%c0_7, %c0_8], %10 {strides = array<i32>} : memref<32x128xf32, #tpu.memory_space<vmem>>, vector<32x128xf32>,
    return
  }
  func.func @transform_0(%arg0: i32) -> (i32, i32) {
    %c0_i32 = arith.constant 0 : i32
    %c0_i32_0 = arith.constant 0 : i32
    return %arg0, %c0_i32 : i32, i32
  }
  func.func @transform_1(%arg0: i32) -> (i32, i32) {
    %c0_i32 = arith.constant 0 : i32
    %c0_i32_0 = arith.constant 0 : i32
    %c0_i32_1 = arith.constant 0 : i32
    return %c0_i32, %c0_i32_0 : i32, i32
  }
  func.func @transform_2(%arg0: i32) -> (i32, i32) {
    %c0_i32 = arith.constant 0 : i32
    %c0_i32_0 = arith.constant 0 : i32
    %c0_i32_1 = arith.constant 0 : i32
    return %c0_i32, %c0_i32_0 : i32, i32
  }
  func.func @transform_3(%arg0: i32) -> (i32, i32) {
    %c0_i32 = arith.constant 0 : i32
    %c0_i32_0 = arith.constant 0 : i32
    return %arg0, %c0_i32 : i32, i32
  }
}

module attributes {stable_mosaic.version = 11 : i64} {
  func.func @_mm_bias_act_kernel(%arg0: i32, %arg1: memref<32x256xbf16, #tpu.memory_space<vmem>>, %arg2: memref<256x128xbf16, #tpu.memory_space<vmem>>, %arg3: memref<1x128xf32, #tpu.memory_space<vmem>>, %arg4: memref<32x128xf32, #tpu.memory_space<vmem>>) attributes {dimension_semantics = [#tpu.dimension_semantics<parallel>], iteration_bounds = array<i64: 1>, scalar_prefetch = 0 : i64, scratch_operands = 0 : i64, tpu.core_type = #tpu.core_type<tc>, window_params = [{transform_indices = @transform_0, window_bounds = array<i64: 32, 256>}, {pipeline_mode = #tpu.pipeline_mode<synchronous>, transform_indices = @transform_1, window_bounds = array<i64: 256, 128>}, {pipeline_mode = #tpu.pipeline_mode<synchronous>, transform_indices = @transform_2, window_bounds = array<i64: 1, 128>}, {transform_indices = @transform_3, window_bounds = array<i64: 32, 128>}]} {
    %c0 = arith.constant 0 : index
    %c0_0 = arith.constant 0 : index
    %0 = vector.load %arg1[%c0, %c0_0] : memref<32x256xbf16, #tpu.memory_space<vmem>>, vector<32x256xbf16>
    %c0_1 = arith.constant 0 : index
    %c0_2 = arith.constant 0 : index
    %1 = vector.load %arg2[%c0_1, %c0_2] : memref<256x128xbf16, #tpu.memory_space<vmem>>, vector<256x128xbf16>
    %cst = arith.constant dense<0.000000e+00> : vector<32x128xf32>
    %2 = tpu.matmul %0, %1, %cst {dimension_numbers = #tpu.dot_dimension_numbers<[1], [0], [0], [1], [0, 0, 1, 1], [], []>} : vector<32x256xbf16>, vector<256x128xbf16>, vector<32x128xf32> -> vector<32x128xf32>
    %c0_3 = arith.constant 0 : index
    %c0_4 = arith.constant 0 : index
    %3 = vector.load %arg3[%c0_3, %c0_4] : memref<1x128xf32, #tpu.memory_space<vmem>>, vector<1x128xf32>
    %4 = vector.broadcast %3 : vector<1x128xf32> to vector<32x128xf32>
    %5 = arith.addf %2, %4 : vector<32x128xf32>
    %cst_5 = arith.constant 0.000000e+00 : f32
    %6 = vector.broadcast %cst_5 : f32 to vector<32x128xf32>
    %7 = arith.cmpf oge, %5, %6 : vector<32x128xf32>
    %cst_6 = arith.constant 2.000000e-01 : f32
    %8 = vector.broadcast %cst_6 : f32 to vector<32x128xf32>
    %9 = arith.mulf %8, %5 : vector<32x128xf32>
    %10 = arith.select %7, %5, %9 : vector<32x128xi1>, vector<32x128xf32>
    %c0_7 = arith.constant 0 : index
    %c0_8 = arith.constant 0 : index
    %11 = vector.load %arg4[%c0_7, %c0_8] : memref<32x128xf32, #tpu.memory_space<vmem>>, vector<32x128xf32>
    tpu.vector_store %arg4[%c0_7, %c0_8], %10 {strides = array<i32>} : memref<32x128xf32, #tpu.memory_space<vmem>>, vector<32x128xf32>,
    return
  }
  func.func @transform_0(%arg0: i32) -> (i32, i32) {
    %c0_i32 = arith.constant 0 : i32
    %c0_i32_0 = arith.constant 0 : i32
    return %arg0, %c0_i32 : i32, i32
  }
  func.func @transform_1(%arg0: i32) -> (i32, i32) {
    %c0_i32 = arith.constant 0 : i32
    %c0_i32_0 = arith.constant 0 : i32
    %c0_i32_1 = arith.constant 0 : i32
    return %c0_i32, %c0_i32_0 : i32, i32
  }
  func.func @transform_2(%arg0: i32) -> (i32, i32) {
    %c0_i32 = arith.constant 0 : i32
    %c0_i32_0 = arith.constant 0 : i32
    %c0_i32_1 = arith.constant 0 : i32
    return %c0_i32, %c0_i32_0 : i32, i32
  }
  func.func @transform_3(%arg0: i32) -> (i32, i32) {
    %c0_i32 = arith.constant 0 : i32
    %c0_i32_0 = arith.constant 0 : i32
    return %arg0, %c0_i32 : i32, i32
  }
}

module attributes {stable_mosaic.version = 11 : i64} {
  func.func @_mm_bias_act_kernel(%arg0: i32, %arg1: memref<16x512xbf16, #tpu.memory_space<vmem>>, %arg2: memref<512x128xbf16, #tpu.memory_space<vmem>>, %arg3: memref<1x128xf32, #tpu.memory_space<vmem>>, %arg4: memref<16x128xf32, #tpu.memory_space<vmem>>) attributes {dimension_semantics = [#tpu.dimension_semantics<parallel>], iteration_bounds = array<i64: 1>, scalar_prefetch = 0 : i64, scratch_operands = 0 : i64, tpu.core_type = #tpu.core_type<tc>, window_params = [{transform_indices = @transform_0, window_bounds = array<i64: 16, 512>}, {pipeline_mode = #tpu.pipeline_mode<synchronous>, transform_indices = @transform_1, window_bounds = array<i64: 512, 128>}, {pipeline_mode = #tpu.pipeline_mode<synchronous>, transform_indices = @transform_2, window_bounds = array<i64: 1, 128>}, {transform_indices = @transform_3, window_bounds = array<i64: 16, 128>}]} {
    %c0 = arith.constant 0 : index
    %c0_0 = arith.constant 0 : index
    %0 = vector.load %arg1[%c0, %c0_0] : memref<16x512xbf16, #tpu.memory_space<vmem>>, vector<16x512xbf16>
    %c0_1 = arith.constant 0 : index
    %c0_2 = arith.constant 0 : index
    %1 = vector.load %arg2[%c0_1, %c0_2] : memref<512x128xbf16, #tpu.memory_space<vmem>>, vector<512x128xbf16>
    %cst = arith.constant dense<0.000000e+00> : vector<16x128xf32>
    %2 = tpu.matmul %0, %1, %cst {dimension_numbers = #tpu.dot_dimension_numbers<[1], [0], [0], [1], [0, 0, 1, 1], [], []>} : vector<16x512xbf16>, vector<512x128xbf16>, vector<16x128xf32> -> vector<16x128xf32>
    %c0_3 = arith.constant 0 : index
    %c0_4 = arith.constant 0 : index
    %3 = vector.load %arg3[%c0_3, %c0_4] : memref<1x128xf32, #tpu.memory_space<vmem>>, vector<1x128xf32>
    %4 = vector.broadcast %3 : vector<1x128xf32> to vector<16x128xf32>
    %5 = arith.addf %2, %4 : vector<16x128xf32>
    %c0_5 = arith.constant 0 : index
    %c0_6 = arith.constant 0 : index
    %6 = vector.load %arg4[%c0_5, %c0_6] : memref<16x128xf32, #tpu.memory_space<vmem>>, vector<16x128xf32>
    tpu.vector_store %arg4[%c0_5, %c0_6], %5 {strides = array<i32>} : memref<16x128xf32, #tpu.memory_space<vmem>>, vector<16x128xf32>,
    return
  }
  func.func @transform_0(%arg0: i32) -> (i32, i32) {
    %c0_i32 = arith.constant 0 : i32
    %c0_i32_0 = arith.constant 0 : i32
    return %arg0, %c0_i32 : i32, i32
  }
  func.func @transform_1(%arg0: i32) -> (i32, i32) {
    %c0_i32 = arith.constant 0 : i32
    %c0_i32_0 = arith.constant 0 : i32
    %c0_i32_1 = arith.constant 0 : i32
    return %c0_i32, %c0_i32_0 : i32, i32
  }
  func.func @transform_2(%arg0: i32) -> (i32, i32) {
    %c0_i32 = arith.constant 0 : i32
    %c0_i32_0 = arith.constant 0 : i32
    %c0_i32_1 = arith.constant 0 : i32
    return %c0_i32, %c0_i32_0 : i32, i32
  }
  func.func @transform_3(%arg0: i32) -> (i32, i32) {
    %c0_i32 = arith.constant 0 : i32
    %c0_i32_0 = arith.constant 0 : i32
    return %arg0, %c0_i32 : i32, i32
  }
}

module attributes {stable_mosaic.version = 11 : i64} {
  func.func @_logit_hinge_kernel(%arg0: memref<8x128xf32, #tpu.memory_space<vmem>>, %arg1: memref<8x128xf32, #tpu.memory_space<vmem>>, %arg2: memref<8x128xf32, #tpu.memory_space<vmem>>, %arg3: memref<4xf32, #tpu.memory_space<smem>>) attributes {dimension_semantics = [], scalar_prefetch = 0 : i64, scratch_operands = 0 : i64, tpu.core_type = #tpu.core_type<tc>} {
    %c0 = arith.constant 0 : index
    %c0_0 = arith.constant 0 : index
    %0 = vector.load %arg0[%c0, %c0_0] : memref<8x128xf32, #tpu.memory_space<vmem>>, vector<8x128xf32>
    %c0_1 = arith.constant 0 : index
    %c0_2 = arith.constant 0 : index
    %1 = vector.load %arg1[%c0_1, %c0_2] : memref<8x128xf32, #tpu.memory_space<vmem>>, vector<8x128xf32>
    %c0_3 = arith.constant 0 : index
    %c0_4 = arith.constant 0 : index
    %2 = vector.load %arg2[%c0_3, %c0_4] : memref<8x128xf32, #tpu.memory_space<vmem>>, vector<8x128xf32>
    %3 = arith.mulf %0, %1 : vector<8x128xf32>
    %4 = vector.shape_cast %3 : vector<8x128xf32> to vector<1x8x128xf32>
    %cst = arith.constant dense<0.000000e+00> : vector<1xf32>
    %5 = vector.multi_reduction <add>, %4, %cst [1, 2] : vector<1x8x128xf32> to vector<1xf32>
    %6 = vector.shape_cast %5 : vector<1xf32> to vector<1x1x1xf32>
    %7 = vector.extract %6[0, 0, 0] : f32 from vector<1x1x1xf32>
    %c0_5 = arith.constant 0 : index
    %8 = memref.load %arg3[%c0_5] : memref<4xf32, #tpu.memory_space<smem>>
    memref.store %7, %arg3[%c0_5] : memref<4xf32, #tpu.memory_space<smem>>
    %cst_6 = arith.constant 1.000000e+00 : f32
    %9 = vector.broadcast %cst_6 : f32 to vector<8x128xf32>
    %10 = arith.subf %9, %0 : vector<8x128xf32>
    %cst_7 = arith.constant 0.000000e+00 : f32
    %11 = vector.broadcast %cst_7 : f32 to vector<8x128xf32>
    %12 = arith.maximumf %10, %11 : vector<8x128xf32>
    %13 = arith.mulf %12, %1 : vector<8x128xf32>
    %14 = vector.shape_cast %13 : vector<8x128xf32> to vector<1x8x128xf32>
    %cst_8 = arith.constant dense<0.000000e+00> : vector<1xf32>
    %15 = vector.multi_reduction <add>, %14, %cst_8 [1, 2] : vector<1x8x128xf32> to vector<1xf32>
    %16 = vector.shape_cast %15 : vector<1xf32> to vector<1x1x1xf32>
    %17 = vector.extract %16[0, 0, 0] : f32 from vector<1x1x1xf32>
    %c1 = arith.constant 1 : index
    %18 = memref.load %arg3[%c1] : memref<4xf32, #tpu.memory_space<smem>>
    memref.store %17, %arg3[%c1] : memref<4xf32, #tpu.memory_space<smem>>
    %19 = arith.mulf %0, %2 : vector<8x128xf32>
    %20 = vector.shape_cast %19 : vector<8x128xf32> to vector<1x8x128xf32>
    %cst_9 = arith.constant dense<0.000000e+00> : vector<1xf32>
    %21 = vector.multi_reduction <add>, %20, %cst_9 [1, 2] : vector<1x8x128xf32> to vector<1xf32>
    %22 = vector.shape_cast %21 : vector<1xf32> to vector<1x1x1xf32>
    %23 = vector.extract %22[0, 0, 0] : f32 from vector<1x1x1xf32>
    %c2 = arith.constant 2 : index
    %24 = memref.load %arg3[%c2] : memref<4xf32, #tpu.memory_space<smem>>
    memref.store %23, %arg3[%c2] : memref<4xf32, #tpu.memory_space<smem>>
    %cst_10 = arith.constant 1.000000e+00 : f32
    %25 = vector.broadcast %cst_10 : f32 to vector<8x128xf32>
    %26 = arith.addf %25, %0 : vector<8x128xf32>
    %cst_11 = arith.constant 0.000000e+00 : f32
    %27 = vector.broadcast %cst_11 : f32 to vector<8x128xf32>
    %28 = arith.maximumf %26, %27 : vector<8x128xf32>
    %29 = arith.mulf %28, %2 : vector<8x128xf32>
    %30 = vector.shape_cast %29 : vector<8x128xf32> to vector<1x8x128xf32>
    %cst_12 = arith.constant dense<0.000000e+00> : vector<1xf32>
    %31 = vector.multi_reduction <add>, %30, %cst_12 [1, 2] : vector<1x8x128xf32> to vector<1xf32>
    %32 = vector.shape_cast %31 : vector<1xf32> to vector<1x1x1xf32>
    %33 = vector.extract %32[0, 0, 0] : f32 from vector<1x1x1xf32>
    %c3 = arith.constant 3 : index
    %34 = memref.load %arg3[%c3] : memref<4xf32, #tpu.memory_space<smem>>
    memref.store %33, %arg3[%c3] : memref<4xf32, #tpu.memory_space<smem>>
    return
  }
}

</mosaic_0001>

<bundles_post_ra>
// kernel: _generator_impl.8
= control target key start
LH: loop header
LB: loop body
LE: loop exit
PB: predicated region body
PF: predicated region fallthrough
CT: control target
= control target key end

     0   :  { %s69_s0 = inlined_call_operand.vmem [shape: f32[16,128], index: 0, kind: input, shape index: {}]   ;;  %s70_s1 = inlined_call_operand.vmem [shape: f32[16,128], index: 1, kind: input, shape index: {}]   ;;  %s71_s2 = inlined_call_operand.vmem [shape: f32[16,128], index: 2, kind: output, shape index: {}]  }
   0x1   :  { %v17_v0 = vld [vmem:[%s69_s0] sm:$0xff]  ;;  %v18_v2 = vld [vmem:[%s69_s0 + $0x8] sm:$0xff] }
   0x2   :  { %v19_v1 = vld [vmem:[%s70_s1] sm:$0xff]  ;;  %v20_v4 = vld [vmem:[%s70_s1 + $0x8] sm:$0xff] }
   0x3   :  { %v21_v3 = vsub.f32 %v17_v0, %v19_v1  ;;  %v22_v5 = vsub.f32 %v18_v2, %v20_v4 }
   0x5   :  { %v25_v6 = vmul.f32 %v21_v3, %v21_v3  ;;  %v26_v7 = vmul.f32 %v22_v5, %v22_v5 }
   0x7   :  { %29 = vst [vmem:[%s71_s2] sm:$0xff] %v25_v6  ;;  %30 = vst [vmem:[%s71_s2 + $0x8] sm:$0xff] %v26_v7 }

// kernel: _generator_impl.9
= control target key start
LH: loop header
LB: loop body
LE: loop exit
PB: predicated region body
PF: predicated region fallthrough
CT: control target
= control target key end

     0   :  { %s1367_s12 = smov 0   ;;  %s1581_s0 = inlined_call_operand.vmem [shape: bf16[1024,128], index: 0, kind: input, shape index: {}]   ;;  %s1582_s1 = inlined_call_operand.vmem [shape: bf16[128,128], index: 1, kind: input, shape index: {}]   ;;  %s1583_s2 = inlined_call_operand.vmem [shape: f32[1,128], index: 2, kind: input, shape index: {}]   ;;  %s1584_s3 = inlined_call_operand.vmem [shape: f32[1024,128], index: 3, kind: output, shape index: {}]  }
   0x1 LB: > { %s1103_s13 = sadd.s32 4294967295, %s1345_s12   ;;  %p1107_p0 = scmp.ge.s32.totalorder %s1345_s12, 1  ;;  %s1345_s12 = sphi %s1367_s12, %s13_s12  }
   0x2   : > { %p138_p1 = scmp.lt.s32.totalorder %s1345_s12, 3 }
   0x4   : > { %p139_p2 = pnand %p1107_p0, %p138_p1 }
   0x5   : > { %v1299_v0 = vld [vmem:[%s1582_s1] sm:$0xff] (!%p139_p2)   ;;  %s1108_s16 = sshll.u32 (!%p139_p2), %s1103_s13, 6  ;;  %v1300_v1 = vld [vmem:[%s1582_s1 + $0x8] sm:$0xff] (!%p139_p2)   ;;  %v1301_v2 = vld [vmem:[%s1582_s1 + $0x10] sm:$0xff] (!%p139_p2)  }
   0x6   : > { %142 = sbr.rel (%p139_p2) target bundleno = 318 (0x13e), region = 32  ;;  %p163_p3 = scmp.lt.s32.totalorder (!%p139_p2), %s1108_s16, 127  ;;  %1195 = vmatprep.subr.bf16.mxu0 (!%p139_p2), %v1299_v0  ;;  %1275 = vmatprep.subr.bf16.mxu1 (!%p139_p2), %v1299_v0  ;;  %v1302_v3 = vld [vmem:[%s1582_s1 + $0x18] sm:$0xff] (!%p139_p2)   ;;  %v1303_v6 = vld [vmem:[%s1582_s1 + $0x20] sm:$0xff] (!%p139_p2)   ;;  %v1304_v7 = vld [vmem:[%s1582_s1 + $0x28] sm:$0xff] (!%p139_p2)  }
   0x7   : > { %1196 = vmatpush3.bf16.msra.mxu0 (!%p139_p2), %v1299_v0  ;;  %1283 = vmatpush3.bf16.msra.mxu1 (!%p139_p2), %v1299_v0  ;;  %v1305_v8 = vld [vmem:[%s1582_s1 + $0x30] sm:$0xff] (!%p139_p2)   ;;  %v1306_v9 = vld [vmem:[%s1582_s1 + $0x38] sm:$0xff] (!%p139_p2)   ;;  %v1442_v40 = vld [vmem:[%s1583_s2] ss:$0 sm:$0xff] (!%p139_p2) }
   0x8   : > { %1197 = vmatprep.subr.bf16.mxu0 (!%p139_p2), %v1300_v1  ;;  %1276 = vmatprep.subr.bf16.mxu1 (!%p139_p2), %v1300_v1 }
   0xb   : > { %1198 = vmatpush3.bf16.msra.mxu0 (!%p139_p2), %v1300_v1  ;;  %1284 = vmatpush3.bf16.msra.mxu1 (!%p139_p2), %v1300_v1 }
   0xc   : > { %1199 = vmatprep.subr.bf16.mxu0 (!%p139_p2), %v1301_v2  ;;  %1277 = vmatprep.subr.bf16.mxu1 (!%p139_p2), %v1301_v2 }
   0xd   : > { %s1586_s16 = smov (!%p163_p3, %s1108_s16), 127 }
   0xe   : > { %s1109_s21 = sshll.u32 %s1586_s16, 2  ;;  %s1111_s10 = sshll.u32 %s1586_s16, 3 }
   0xf   : > { %s1390_s24 = scalar_lea.vmem %s1581_s0, %s1109_s21  ;;  %1200 = vmatpush3.bf16.msra.mxu0 %v1301_v2  ;;  %1285 = vmatpush3.bf16.msra.mxu1 %v1301_v2  ;;  %s1452_s14 = scalar_lea.vmem %s1584_s3, %s1111_s10 }
  0x10   : > { %v1307_v4 = vld [vmem:[%s1390_s24] sm:$0xff]   ;;  %1201 = vmatprep.subr.bf16.mxu0 %v1302_v3  ;;  %1278 = vmatprep.subr.bf16.mxu1 %v1302_v3  ;;  %v1309_v10 = vld [vmem:[%s1390_s24 + $0x8] sm:$0xff]   ;;  %v1311_v12 = vld [vmem:[%s1390_s24 + $0x10] sm:$0xff]  }
  0x11   : > { %v1308_v5 = vld [vmem:[%s1390_s24 + $0x80] sm:$0xff]   ;;  %1211 = vmatprep.mubr.bf16.mxu0 %v1307_v4  ;;  %v1310_v11 = vld [vmem:[%s1390_s24 + $0x88] sm:$0xff]   ;;  %v1312_v13 = vld [vmem:[%s1390_s24 + $0x90] sm:$0xff]  }
  0x12   : > { %1243 = vmatprep.mubr.bf16.mxu1 %v1308_v5  ;;  %v1313_v14 = vld [vmem:[%s1390_s24 + $0x18] sm:$0xff]   ;;  %v1315_v16 = vld [vmem:[%s1390_s24 + $0x20] sm:$0xff]   ;;  %v1317_v18 = vld [vmem:[%s1390_s24 + $0x28] sm:$0xff]  }
  0x13   : > { %1202 = vmatpush3.bf16.msra.mxu0 %v1302_v3  ;;  %1286 = vmatpush3.bf16.msra.mxu1 %v1302_v3  ;;  %v1314_v15 = vld [vmem:[%s1390_s24 + $0x98] sm:$0xff]   ;;  %v1316_v17 = vld [vmem:[%s1390_s24 + $0xa0] sm:$0xff]   ;;  %v1318_v19 = vld [vmem:[%s1390_s24 + $0xa8] sm:$0xff]  }
  0x14   : > { %1203 = vmatprep.subr.bf16.mxu0 %v1303_v6  ;;  %1279 = vmatprep.subr.bf16.mxu1 %v1303_v6  ;;  %v1319_v20 = vld [vmem:[%s1390_s24 + $0x30] sm:$0xff]   ;;  %v1321_v22 = vld [vmem:[%s1390_s24 + $0x38] sm:$0xff]   ;;  %v1323_v24 = vld [vmem:[%s1390_s24 + $0x40] sm:$0xff]  }
  0x15   : > { %v1320_v21 = vld [vmem:[%s1390_s24 + $0xb0] sm:$0xff]   ;;  %v1322_v23 = vld [vmem:[%s1390_s24 + $0xb8] sm:$0xff]   ;;  %v1324_v25 = vld [vmem:[%s1390_s24 + $0xc0] sm:$0xff]  }
  0x16   : > { %v1325_v26 = vld [vmem:[%s1390_s24 + $0x48] sm:$0xff]   ;;  %v1327_v28 = vld [vmem:[%s1390_s24 + $0x50] sm:$0xff]   ;;  %v1329_v30 = vld [vmem:[%s1390_s24 + $0x58] sm:$0xff]  }
  0x17   : > { %1204 = vmatpush3.bf16.msra.mxu0 %v1303_v6  ;;  %1287 = vmatpush3.bf16.msra.mxu1 %v1303_v6  ;;  %v1326_v27 = vld [vmem:[%s1390_s24 + $0xc8] sm:$0xff]   ;;  %v1328_v29 = vld [vmem:[%s1390_s24 + $0xd0] sm:$0xff]   ;;  %v1330_v31 = vld [vmem:[%s1390_s24 + $0xd8] sm:$0xff]  }
  0x18   : > { %1205 = vmatprep.subr.bf16.mxu0 %v1304_v7  ;;  %1280 = vmatprep.subr.bf16.mxu1 %v1304_v7  ;;  %v1331_v32 = vld [vmem:[%s1390_s24 + $0x60] sm:$0xff]   ;;  %v1333_v34 = vld [vmem:[%s1390_s24 + $0x68] sm:$0xff]   ;;  %v1335_v36 = vld [vmem:[%s1390_s24 + $0x70] sm:$0xff]  }
  0x19   : > { %v1332_v33 = vld [vmem:[%s1390_s24 + $0xe0] sm:$0xff]   ;;  %v1334_v35 = vld [vmem:[%s1390_s24 + $0xe8] sm:$0xff]   ;;  %v1336_v37 = vld [vmem:[%s1390_s24 + $0xf0] sm:$0xff]  }
  0x1a   : > { %v1337_v38 = vld [vmem:[%s1390_s24 + $0x78] sm:$0xff]  }
  0x1b   : > { %1206 = vmatpush3.bf16.msra.mxu0 %v1304_v7  ;;  %1288 = vmatpush3.bf16.msra.mxu1 %v1304_v7  ;;  %v1338_v39 = vld [vmem:[%s1390_s24 + $0xf8] sm:$0xff]  }
  0x1c   : > { %1207 = vmatprep.subr.bf16.mxu0 %v1305_v8  ;;  %1281 = vmatprep.subr.bf16.mxu1 %v1305_v8 }
  0x1f   : > { %1208 = vmatpush3.bf16.msra.mxu0 %v1305_v8  ;;  %1289 = vmatpush3.bf16.msra.mxu1 %v1305_v8 }
  0x20   : > { %1209 = vmatprep.subr.bf16.mxu0 %v1306_v9  ;;  %1282 = vmatprep.subr.bf16.mxu1 %v1306_v9 }
  0x23   : > { %1210 = vmatpush3.bf16.msra.mxu0 %v1306_v9  ;;  %1290 = vmatpush3.bf16.msra.mxu1 %v1306_v9 }
  0x26   : > { %1212 = vmatmul.mubr.bf16.vlgmr.msra.gmra.mrb[0].mxu0 %v1309_v10  ;;  %1244 = vmatmul.mubr.bf16.vlgmr.msra.gmra.mrb[0].mxu1 %v1310_v11 }
  0x27   : > { %1215 = vmatprep.mubr.bf16.mxu0 %v1311_v12  ;;  %1247 = vmatprep.mubr.bf16.mxu1 %v1312_v13 }
  0x2e   : > { %1216 = vmatmul.mubr.bf16.gmra.mrb[4].mxu0 %v1313_v14  ;;  %1248 = vmatmul.mubr.bf16.gmra.mrb[4].mxu1 %v1314_v15 }
  0x2f   : > { %1219 = vmatprep.mubr.bf16.mxu0 %v1315_v16  ;;  %1251 = vmatprep.mubr.bf16.mxu1 %v1316_v17 }
  0x36   : > { %1220 = vmatmul.mubr.bf16.gmra.mrb[8].mxu0 %v1317_v18  ;;  %1252 = vmatmul.mubr.bf16.gmra.mrb[8].mxu1 %v1318_v19 }
  0x37   : > { %1223 = vmatprep.mubr.bf16.mxu0 %v1319_v20  ;;  %1255 = vmatprep.mubr.bf16.mxu1 %v1320_v21 }
  0x3e   : > { %1224 = vmatmul.mubr.bf16.gmra.mrb[12].mxu0 %v1321_v22  ;;  %1256 = vmatmul.mubr.bf16.gmra.mrb[12].mxu1 %v1322_v23 }
  0x3f   : > { %1227 = vmatprep.mubr.bf16.mxu0 %v1323_v24  ;;  %1259 = vmatprep.mubr.bf16.mxu1 %v1324_v25 }
  0x46   : > { %1228 = vmatmul.mubr.bf16.gmra.mrb[16].mxu0 %v1325_v26  ;;  %1260 = vmatmul.mubr.bf16.gmra.mrb[16].mxu1 %v1326_v27 }
  0x47   : > { %1231 = vmatprep.mubr.bf16.mxu0 %v1327_v28  ;;  %1263 = vmatprep.mubr.bf16.mxu1 %v1328_v29 }
  0x4e   : > { %1232 = vmatmul.mubr.bf16.gmra.mrb[20].mxu0 %v1329_v30  ;;  %1264 = vmatmul.mubr.bf16.gmra.mrb[20].mxu1 %v1330_v31 }
  0x4f   : > { %1235 = vmatprep.mubr.bf16.mxu0 %v1331_v32  ;;  %1267 = vmatprep.mubr.bf16.mxu1 %v1332_v33 }
  0x56   : > { %1236 = vmatmul.mubr.bf16.gmra.mrb[24].mxu0 %v1333_v34  ;;  %1268 = vmatmul.mubr.bf16.gmra.mrb[24].mxu1 %v1334_v35 }
  0x57   : > { %1239 = vmatprep.mubr.bf16.mxu0 %v1335_v36  ;;  %1271 = vmatprep.mubr.bf16.mxu1 %v1336_v37 }
  0x5e   : > { %1240 = vmatmul.mubr.bf16.gmra.mrb[28].mxu0 %v1337_v38  ;;  %1272 = vmatmul.mubr.bf16.gmra.mrb[28].mxu1 %v1338_v39 }
  0xf9   : > { %v1213_v41 = vpop.f32.mrb[0].mxu0  ;;  %v1245_v42 = vpop.f32.mrb[0].mxu1 }
  0xfa   : > { %v545_v43 = vadd.f32 %v1213_v41, %v1442_v40  ;;  %v673_v44 = vadd.f32 %v1245_v42, %v1442_v40  ;;  %v536_v45 = vpop.f32.mrb[1].mxu0  ;;  %v664_v46 = vpop.f32.mrb[1].mxu1 }
  0xfb   : > { %v537_v47 = vadd.f32 %v1442_v40, %v536_v45  ;;  %v665_v48 = vadd.f32 %v1442_v40, %v664_v46  ;;  %v1214_v49 = vpop.f32.mrb[2].mxu0  ;;  %v1246_v50 = vpop.f32.mrb[2].mxu1 }
  0xfc   : > { %vm793_vm0 = vcmp.ge.f32.partialorder %v545_v43, 0.0  ;;  %v857_v51 = vmul.f32 0.0, %v545_v43  ;;  %vm825_vm1 = vcmp.ge.f32.partialorder %v673_v44, 0.0  ;;  %v889_v52 = vmul.f32 0.0, %v673_v44  ;;  %v539_v53 = vpop.f32.mrb[3].mxu0  ;;  %v667_v54 = vpop.f32.mrb[3].mxu1 }
  0xfd   : > { %vm791_vm2 = vcmp.ge.f32.partialorder %v537_v47, 0.0  ;;  %v855_v55 = vmul.f32 0.0, %v537_v47  ;;  %vm823_vm3 = vcmp.ge.f32.partialorder %v665_v48, 0.0  ;;  %v887_v56 = vmul.f32 0.0, %v665_v48 }
  0xfe   : > { %v921_v57 = vsel %vm793_vm0, %v545_v43, %v857_v51  ;;  %v953_v58 = vsel %vm825_vm1, %v673_v44, %v889_v52  ;;  %v548_v59 = vadd.f32 %v1214_v49, %v1442_v40  ;;  %v676_v60 = vadd.f32 %v1246_v50, %v1442_v40 }
  0xff   : > { %985 = vst [vmem:[%s1452_s14 + $0x10] sm:$0xff] %v921_v57  ;;  %1017 = vst [vmem:[%s1452_s14 + $0x110] sm:$0xff] %v953_v58  ;;  %v919_v61 = vsel %vm791_vm2, %v537_v47, %v855_v55  ;;  %v951_v62 = vsel %vm823_vm3, %v665_v48, %v887_v56  ;;  %v540_v63 = vadd.f32 %v1442_v40, %v539_v53 }
 0x100   : > { %v668_v0 = vadd.f32 %v1442_v40, %v667_v54  ;;  %983 = vst [vmem:[%s1452_s14] sm:$0xff] %v919_v61  ;;  %1015 = vst [vmem:[%s1452_s14 + $0x100] sm:$0xff] %v951_v62  ;;  %vm794_vm4 = vcmp.ge.f32.partialorder %v548_v59, 0.0  ;;  %v858_v1 = vmul.f32 0.0, %v548_v59  ;;  %vm826_vm5 = vcmp.ge.f32.partialorder %v676_v60, 0.0 }
 0x101   : > { %v890_v2 = vmul.f32 0.0, %v676_v60  ;;  %vm792_vm6 = vcmp.ge.f32.partialorder %v540_v63, 0.0  ;;  %v856_v3 = vmul.f32 0.0, %v540_v63  ;;  %v1217_v5 = vpop.f32.mrb[4].mxu0  ;;  %v1249_v6 = vpop.f32.mrb[4].mxu1 }
 0x102   : > { %vm824_vm7 = vcmp.ge.f32.partialorder %v668_v0, 0.0  ;;  %v888_v4 = vmul.f32 0.0, %v668_v0  ;;  %v922_v7 = vsel %vm794_vm4, %v548_v59, %v858_v1  ;;  %v561_v9 = vadd.f32 %v1217_v5, %v1442_v40  ;;  %v552_v11 = vpop.f32.mrb[5].mxu0  ;;  %v680_v12 = vpop.f32.mrb[5].mxu1 }
 0x103   : > { %v954_v8 = vsel %vm826_vm5, %v676_v60, %v890_v2  ;;  %v689_v10 = vadd.f32 %v1249_v6, %v1442_v40  ;;  %986 = vst [vmem:[%s1452_s14 + $0x18] sm:$0xff] %v922_v7  ;;  %v920_v13 = vsel %vm792_vm6, %v540_v63, %v856_v3  ;;  %v553_v15 = vadd.f32 %v1442_v40, %v552_v11  ;;  %v1218_v17 = vpop.f32.mrb[6].mxu0  ;;  %v1250_v18 = vpop.f32.mrb[6].mxu1 }
 0x104   : > { %1018 = vst [vmem:[%s1452_s14 + $0x118] sm:$0xff] %v954_v8  ;;  %v952_v14 = vsel %vm824_vm7, %v668_v0, %v888_v4  ;;  %v681_v16 = vadd.f32 %v1442_v40, %v680_v12  ;;  %984 = vst [vmem:[%s1452_s14 + $0x8] sm:$0xff] %v920_v13  ;;  %vm797_vm8 = vcmp.ge.f32.partialorder %v561_v9, 0.0  ;;  %v861_v19 = vmul.f32 0.0, %v561_v9  ;;  %v555_v21 = vpop.f32.mrb[7].mxu0  ;;  %v683_v22 = vpop.f32.mrb[7].mxu1 }
 0x105   : > { %1016 = vst [vmem:[%s1452_s14 + $0x108] sm:$0xff] %v952_v14  ;;  %vm829_vm9 = vcmp.ge.f32.partialorder %v689_v10, 0.0  ;;  %v893_v20 = vmul.f32 0.0, %v689_v10  ;;  %vm795_vm10 = vcmp.ge.f32.partialorder %v553_v15, 0.0  ;;  %v859_v23 = vmul.f32 0.0, %v553_v15 }
 0x106   : > { %vm827_vm11 = vcmp.ge.f32.partialorder %v681_v16, 0.0  ;;  %v891_v24 = vmul.f32 0.0, %v681_v16  ;;  %v925_v25 = vsel %vm797_vm8, %v561_v9, %v861_v19  ;;  %v564_v27 = vadd.f32 %v1218_v17, %v1442_v40 }
 0x107   : > { %v957_v26 = vsel %vm829_vm9, %v689_v10, %v893_v20  ;;  %v692_v28 = vadd.f32 %v1250_v18, %v1442_v40  ;;  %989 = vst [vmem:[%s1452_s14 + $0x30] sm:$0xff] %v925_v25  ;;  %v923_v29 = vsel %vm795_vm10, %v553_v15, %v859_v23  ;;  %v556_v31 = vadd.f32 %v1442_v40, %v555_v21 }
 0x108   : > { %1021 = vst [vmem:[%s1452_s14 + $0x130] sm:$0xff] %v957_v26  ;;  %v955_v30 = vsel %vm827_vm11, %v681_v16, %v891_v24  ;;  %v684_v32 = vadd.f32 %v1442_v40, %v683_v22  ;;  %987 = vst [vmem:[%s1452_s14 + $0x20] sm:$0xff] %v923_v29  ;;  %vm798_vm12 = vcmp.ge.f32.partialorder %v564_v27, 0.0  ;;  %v862_v33 = vmul.f32 0.0, %v564_v27 }
 0x109   : > { %1019 = vst [vmem:[%s1452_s14 + $0x120] sm:$0xff] %v955_v30  ;;  %vm830_vm13 = vcmp.ge.f32.partialorder %v692_v28, 0.0  ;;  %v894_v34 = vmul.f32 0.0, %v692_v28  ;;  %vm796_vm14 = vcmp.ge.f32.partialorder %v556_v31, 0.0  ;;  %v860_v35 = vmul.f32 0.0, %v556_v31  ;;  %v1221_v37 = vpop.f32.mrb[8].mxu0 }
 0x10a   : > { %vm828_vm15 = vcmp.ge.f32.partialorder %v684_v32, 0.0  ;;  %v892_v36 = vmul.f32 0.0, %v684_v32  ;;  %v1253_v38 = vpop.f32.mrb[8].mxu1  ;;  %v926_v39 = vsel %vm798_vm12, %v564_v27, %v862_v33  ;;  %v577_v42 = vadd.f32 %v1221_v37, %v1442_v40  ;;  %v568_v44 = vpop.f32.mrb[9].mxu0 }
 0x10b   : > { %v958_v41 = vsel %vm830_vm13, %v692_v28, %v894_v34  ;;  %v705_v43 = vadd.f32 %v1253_v38, %v1442_v40  ;;  %v696_v45 = vpop.f32.mrb[9].mxu1  ;;  %990 = vst [vmem:[%s1452_s14 + $0x38] sm:$0xff] %v926_v39  ;;  %v924_v46 = vsel %vm796_vm14, %v556_v31, %v860_v35  ;;  %v569_v48 = vadd.f32 %v1442_v40, %v568_v44  ;;  %v1222_v50 = vpop.f32.mrb[10].mxu0 }
 0x10c   : > { %1022 = vst [vmem:[%s1452_s14 + $0x138] sm:$0xff] %v958_v41  ;;  %v956_v47 = vsel %vm828_vm15, %v684_v32, %v892_v36  ;;  %v697_v49 = vadd.f32 %v1442_v40, %v696_v45  ;;  %v1254_v51 = vpop.f32.mrb[10].mxu1  ;;  %988 = vst [vmem:[%s1452_s14 + $0x28] sm:$0xff] %v924_v46  ;;  %vm801_vm0 = vcmp.ge.f32.partialorder %v577_v42, 0.0  ;;  %v865_v52 = vmul.f32 0.0, %v577_v42  ;;  %v571_v54 = vpop.f32.mrb[11].mxu0 }
 0x10d   : > { %1020 = vst [vmem:[%s1452_s14 + $0x128] sm:$0xff] %v956_v47  ;;  %vm833_vm1 = vcmp.ge.f32.partialorder %v705_v43, 0.0  ;;  %v897_v53 = vmul.f32 0.0, %v705_v43  ;;  %v699_v55 = vpop.f32.mrb[11].mxu1  ;;  %vm799_vm2 = vcmp.ge.f32.partialorder %v569_v48, 0.0  ;;  %v863_v56 = vmul.f32 0.0, %v569_v48 }
 0x10e   : > { %vm831_vm3 = vcmp.ge.f32.partialorder %v697_v49, 0.0  ;;  %v895_v57 = vmul.f32 0.0, %v697_v49  ;;  %v929_v58 = vsel %vm801_vm0, %v577_v42, %v865_v52  ;;  %v580_v60 = vadd.f32 %v1222_v50, %v1442_v40 }
 0x10f   : > { %v961_v59 = vsel %vm833_vm1, %v705_v43, %v897_v53  ;;  %v708_v61 = vadd.f32 %v1254_v51, %v1442_v40  ;;  %993 = vst [vmem:[%s1452_s14 + $0x50] sm:$0xff] %v929_v58  ;;  %v927_v62 = vsel %vm799_vm2, %v569_v48, %v863_v56  ;;  %v572_v0 = vadd.f32 %v1442_v40, %v571_v54 }
 0x110   : > { %1025 = vst [vmem:[%s1452_s14 + $0x150] sm:$0xff] %v961_v59  ;;  %v959_v63 = vsel %vm831_vm3, %v697_v49, %v895_v57  ;;  %v700_v1 = vadd.f32 %v1442_v40, %v699_v55  ;;  %991 = vst [vmem:[%s1452_s14 + $0x40] sm:$0xff] %v927_v62  ;;  %vm802_vm4 = vcmp.ge.f32.partialorder %v580_v60, 0.0  ;;  %v866_v2 = vmul.f32 0.0, %v580_v60 }
 0x111   : > { %1023 = vst [vmem:[%s1452_s14 + $0x140] sm:$0xff] %v959_v63  ;;  %vm834_vm5 = vcmp.ge.f32.partialorder %v708_v61, 0.0  ;;  %v898_v3 = vmul.f32 0.0, %v708_v61  ;;  %vm800_vm6 = vcmp.ge.f32.partialorder %v572_v0, 0.0  ;;  %v864_v4 = vmul.f32 0.0, %v572_v0  ;;  %v1225_v6 = vpop.f32.mrb[12].mxu0 }
 0x112   : > { %vm832_vm7 = vcmp.ge.f32.partialorder %v700_v1, 0.0  ;;  %v896_v5 = vmul.f32 0.0, %v700_v1  ;;  %v1257_v7 = vpop.f32.mrb[12].mxu1  ;;  %v930_v8 = vsel %vm802_vm4, %v580_v60, %v866_v2  ;;  %v593_v10 = vadd.f32 %v1225_v6, %v1442_v40  ;;  %v584_v12 = vpop.f32.mrb[13].mxu0 }
 0x113   : > { %v962_v9 = vsel %vm834_vm5, %v708_v61, %v898_v3  ;;  %v721_v11 = vadd.f32 %v1257_v7, %v1442_v40  ;;  %v712_v13 = vpop.f32.mrb[13].mxu1  ;;  %994 = vst [vmem:[%s1452_s14 + $0x58] sm:$0xff] %v930_v8  ;;  %v928_v14 = vsel %vm800_vm6, %v572_v0, %v864_v4  ;;  %v585_v16 = vadd.f32 %v1442_v40, %v584_v12  ;;  %v1226_v18 = vpop.f32.mrb[14].mxu0 }
 0x114   : > { %1026 = vst [vmem:[%s1452_s14 + $0x158] sm:$0xff] %v962_v9  ;;  %v960_v15 = vsel %vm832_vm7, %v700_v1, %v896_v5  ;;  %v713_v17 = vadd.f32 %v1442_v40, %v712_v13  ;;  %v1258_v19 = vpop.f32.mrb[14].mxu1  ;;  %992 = vst [vmem:[%s1452_s14 + $0x48] sm:$0xff] %v928_v14  ;;  %vm805_vm8 = vcmp.ge.f32.partialorder %v593_v10, 0.0  ;;  %v869_v20 = vmul.f32 0.0, %v593_v10  ;;  %v587_v22 = vpop.f32.mrb[15].mxu0 }
 0x115   : > { %1024 = vst [vmem:[%s1452_s14 + $0x148] sm:$0xff] %v960_v15  ;;  %vm837_vm9 = vcmp.ge.f32.partialorder %v721_v11, 0.0  ;;  %v901_v21 = vmul.f32 0.0, %v721_v11  ;;  %v715_v23 = vpop.f32.mrb[15].mxu1  ;;  %vm803_vm10 = vcmp.ge.f32.partialorder %v585_v16, 0.0  ;;  %v867_v24 = vmul.f32 0.0, %v585_v16 }
 0x116   : > { %vm835_vm11 = vcmp.ge.f32.partialorder %v713_v17, 0.0  ;;  %v899_v25 = vmul.f32 0.0, %v713_v17  ;;  %v933_v26 = vsel %vm805_vm8, %v593_v10, %v869_v20  ;;  %v596_v28 = vadd.f32 %v1226_v18, %v1442_v40 }
 0x117   : > { %v965_v27 = vsel %vm837_vm9, %v721_v11, %v901_v21  ;;  %v724_v29 = vadd.f32 %v1258_v19, %v1442_v40  ;;  %997 = vst [vmem:[%s1452_s14 + $0x70] sm:$0xff] %v933_v26  ;;  %v931_v30 = vsel %vm803_vm10, %v585_v16, %v867_v24  ;;  %v588_v32 = vadd.f32 %v1442_v40, %v587_v22 }
 0x118   : > { %1029 = vst [vmem:[%s1452_s14 + $0x170] sm:$0xff] %v965_v27  ;;  %v963_v31 = vsel %vm835_vm11, %v713_v17, %v899_v25  ;;  %v716_v33 = vadd.f32 %v1442_v40, %v715_v23  ;;  %995 = vst [vmem:[%s1452_s14 + $0x60] sm:$0xff] %v931_v30  ;;  %vm806_vm12 = vcmp.ge.f32.partialorder %v596_v28, 0.0  ;;  %v870_v34 = vmul.f32 0.0, %v596_v28 }
 0x119   : > { %1027 = vst [vmem:[%s1452_s14 + $0x160] sm:$0xff] %v963_v31  ;;  %vm838_vm13 = vcmp.ge.f32.partialorder %v724_v29, 0.0  ;;  %v902_v35 = vmul.f32 0.0, %v724_v29  ;;  %vm804_vm14 = vcmp.ge.f32.partialorder %v588_v32, 0.0  ;;  %v868_v36 = vmul.f32 0.0, %v588_v32  ;;  %v1229_v38 = vpop.f32.mrb[16].mxu0 }
 0x11a   : > { %vm836_vm15 = vcmp.ge.f32.partialorder %v716_v33, 0.0  ;;  %v900_v37 = vmul.f32 0.0, %v716_v33  ;;  %v1261_v39 = vpop.f32.mrb[16].mxu1  ;;  %v934_v41 = vsel %vm806_vm12, %v596_v28, %v870_v34  ;;  %v609_v43 = vadd.f32 %v1229_v38, %v1442_v40  ;;  %v600_v45 = vpop.f32.mrb[17].mxu0 }
 0x11b   : > { %v966_v42 = vsel %vm838_vm13, %v724_v29, %v902_v35  ;;  %v737_v44 = vadd.f32 %v1261_v39, %v1442_v40  ;;  %v728_v46 = vpop.f32.mrb[17].mxu1  ;;  %998 = vst [vmem:[%s1452_s14 + $0x78] sm:$0xff] %v934_v41  ;;  %v932_v47 = vsel %vm804_vm14, %v588_v32, %v868_v36  ;;  %v601_v49 = vadd.f32 %v1442_v40, %v600_v45  ;;  %v1230_v51 = vpop.f32.mrb[18].mxu0 }
 0x11c   : > { %1030 = vst [vmem:[%s1452_s14 + $0x178] sm:$0xff] %v966_v42  ;;  %v964_v48 = vsel %vm836_vm15, %v716_v33, %v900_v37  ;;  %v729_v50 = vadd.f32 %v1442_v40, %v728_v46  ;;  %v1262_v52 = vpop.f32.mrb[18].mxu1  ;;  %996 = vst [vmem:[%s1452_s14 + $0x68] sm:$0xff] %v932_v47  ;;  %vm809_vm0 = vcmp.ge.f32.partialorder %v609_v43, 0.0  ;;  %v873_v53 = vmul.f32 0.0, %v609_v43  ;;  %v603_v55 = vpop.f32.mrb[19].mxu0 }
 0x11d   : > { %1028 = vst [vmem:[%s1452_s14 + $0x168] sm:$0xff] %v964_v48  ;;  %vm841_vm1 = vcmp.ge.f32.partialorder %v737_v44, 0.0  ;;  %v905_v54 = vmul.f32 0.0, %v737_v44  ;;  %v731_v56 = vpop.f32.mrb[19].mxu1  ;;  %vm807_vm2 = vcmp.ge.f32.partialorder %v601_v49, 0.0  ;;  %v871_v57 = vmul.f32 0.0, %v601_v49 }
 0x11e   : > { %vm839_vm3 = vcmp.ge.f32.partialorder %v729_v50, 0.0  ;;  %v903_v58 = vmul.f32 0.0, %v729_v50  ;;  %v937_v59 = vsel %vm809_vm0, %v609_v43, %v873_v53  ;;  %v612_v61 = vadd.f32 %v1230_v51, %v1442_v40 }
 0x11f   : > { %v969_v60 = vsel %vm841_vm1, %v737_v44, %v905_v54  ;;  %v740_v62 = vadd.f32 %v1262_v52, %v1442_v40  ;;  %1001 = vst [vmem:[%s1452_s14 + $0x90] sm:$0xff] %v937_v59  ;;  %v935_v63 = vsel %vm807_vm2, %v601_v49, %v871_v57  ;;  %v604_v1 = vadd.f32 %v1442_v40, %v603_v55 }
 0x120   : > { %1033 = vst [vmem:[%s1452_s14 + $0x190] sm:$0xff] %v969_v60  ;;  %v967_v0 = vsel %vm839_vm3, %v729_v50, %v903_v58  ;;  %v732_v2 = vadd.f32 %v1442_v40, %v731_v56  ;;  %999 = vst [vmem:[%s1452_s14 + $0x80] sm:$0xff] %v935_v63  ;;  %vm810_vm4 = vcmp.ge.f32.partialorder %v612_v61, 0.0  ;;  %v874_v3 = vmul.f32 0.0, %v612_v61 }
 0x121   : > { %1031 = vst [vmem:[%s1452_s14 + $0x180] sm:$0xff] %v967_v0  ;;  %vm842_vm5 = vcmp.ge.f32.partialorder %v740_v62, 0.0  ;;  %v906_v4 = vmul.f32 0.0, %v740_v62  ;;  %vm808_vm6 = vcmp.ge.f32.partialorder %v604_v1, 0.0  ;;  %v872_v5 = vmul.f32 0.0, %v604_v1  ;;  %v1233_v7 = vpop.f32.mrb[20].mxu0 }
 0x122   : > { %vm840_vm7 = vcmp.ge.f32.partialorder %v732_v2, 0.0  ;;  %v904_v6 = vmul.f32 0.0, %v732_v2  ;;  %v1265_v8 = vpop.f32.mrb[20].mxu1  ;;  %v938_v9 = vsel %vm810_vm4, %v612_v61, %v874_v3  ;;  %v625_v11 = vadd.f32 %v1233_v7, %v1442_v40  ;;  %v616_v13 = vpop.f32.mrb[21].mxu0 }
 0x123   : > { %v970_v10 = vsel %vm842_vm5, %v740_v62, %v906_v4  ;;  %v753_v12 = vadd.f32 %v1265_v8, %v1442_v40  ;;  %v744_v14 = vpop.f32.mrb[21].mxu1  ;;  %1002 = vst [vmem:[%s1452_s14 + $0x98] sm:$0xff] %v938_v9  ;;  %v936_v15 = vsel %vm808_vm6, %v604_v1, %v872_v5  ;;  %v617_v17 = vadd.f32 %v1442_v40, %v616_v13  ;;  %v1234_v19 = vpop.f32.mrb[22].mxu0 }
 0x124   : > { %1034 = vst [vmem:[%s1452_s14 + $0x198] sm:$0xff] %v970_v10  ;;  %v968_v16 = vsel %vm840_vm7, %v732_v2, %v904_v6  ;;  %v745_v18 = vadd.f32 %v1442_v40, %v744_v14  ;;  %v1266_v20 = vpop.f32.mrb[22].mxu1  ;;  %1000 = vst [vmem:[%s1452_s14 + $0x88] sm:$0xff] %v936_v15  ;;  %vm813_vm8 = vcmp.ge.f32.partialorder %v625_v11, 0.0  ;;  %v877_v21 = vmul.f32 0.0, %v625_v11  ;;  %v619_v23 = vpop.f32.mrb[23].mxu0 }
 0x125   : > { %1032 = vst [vmem:[%s1452_s14 + $0x188] sm:$0xff] %v968_v16  ;;  %vm845_vm9 = vcmp.ge.f32.partialorder %v753_v12, 0.0  ;;  %v909_v22 = vmul.f32 0.0, %v753_v12  ;;  %v747_v24 = vpop.f32.mrb[23].mxu1  ;;  %vm811_vm10 = vcmp.ge.f32.partialorder %v617_v17, 0.0  ;;  %v875_v25 = vmul.f32 0.0, %v617_v17 }
 0x126   : > { %vm843_vm11 = vcmp.ge.f32.partialorder %v745_v18, 0.0  ;;  %v907_v26 = vmul.f32 0.0, %v745_v18  ;;  %v941_v27 = vsel %vm813_vm8, %v625_v11, %v877_v21  ;;  %v628_v29 = vadd.f32 %v1234_v19, %v1442_v40 }
 0x127   : > { %v973_v28 = vsel %vm845_vm9, %v753_v12, %v909_v22  ;;  %v756_v30 = vadd.f32 %v1266_v20, %v1442_v40  ;;  %1005 = vst [vmem:[%s1452_s14 + $0xb0] sm:$0xff] %v941_v27  ;;  %v939_v31 = vsel %vm811_vm10, %v617_v17, %v875_v25  ;;  %v620_v33 = vadd.f32 %v1442_v40, %v619_v23 }
 0x128   : > { %1037 = vst [vmem:[%s1452_s14 + $0x1b0] sm:$0xff] %v973_v28  ;;  %v971_v32 = vsel %vm843_vm11, %v745_v18, %v907_v26  ;;  %v748_v34 = vadd.f32 %v1442_v40, %v747_v24  ;;  %1003 = vst [vmem:[%s1452_s14 + $0xa0] sm:$0xff] %v939_v31  ;;  %vm814_vm12 = vcmp.ge.f32.partialorder %v628_v29, 0.0  ;;  %v878_v35 = vmul.f32 0.0, %v628_v29 }
 0x129   : > { %1035 = vst [vmem:[%s1452_s14 + $0x1a0] sm:$0xff] %v971_v32  ;;  %vm846_vm13 = vcmp.ge.f32.partialorder %v756_v30, 0.0  ;;  %v910_v36 = vmul.f32 0.0, %v756_v30  ;;  %vm812_vm14 = vcmp.ge.f32.partialorder %v620_v33, 0.0  ;;  %v876_v37 = vmul.f32 0.0, %v620_v33  ;;  %v1237_v39 = vpop.f32.mrb[24].mxu0 }
 0x12a   : > { %vm844_vm15 = vcmp.ge.f32.partialorder %v748_v34, 0.0  ;;  %v908_v38 = vmul.f32 0.0, %v748_v34  ;;  %v1269_v41 = vpop.f32.mrb[24].mxu1  ;;  %v942_v42 = vsel %vm814_vm12, %v628_v29, %v878_v35  ;;  %v641_v44 = vadd.f32 %v1237_v39, %v1442_v40  ;;  %v632_v46 = vpop.f32.mrb[25].mxu0 }
 0x12b   : > { %v974_v43 = vsel %vm846_vm13, %v756_v30, %v910_v36  ;;  %v769_v45 = vadd.f32 %v1269_v41, %v1442_v40  ;;  %v760_v47 = vpop.f32.mrb[25].mxu1  ;;  %1006 = vst [vmem:[%s1452_s14 + $0xb8] sm:$0xff] %v942_v42  ;;  %v940_v48 = vsel %vm812_vm14, %v620_v33, %v876_v37  ;;  %v633_v50 = vadd.f32 %v1442_v40, %v632_v46  ;;  %v1238_v52 = vpop.f32.mrb[26].mxu0 }
 0x12c   : > { %1038 = vst [vmem:[%s1452_s14 + $0x1b8] sm:$0xff] %v974_v43  ;;  %v972_v49 = vsel %vm844_vm15, %v748_v34, %v908_v38  ;;  %v761_v51 = vadd.f32 %v1442_v40, %v760_v47  ;;  %v1270_v53 = vpop.f32.mrb[26].mxu1  ;;  %1004 = vst [vmem:[%s1452_s14 + $0xa8] sm:$0xff] %v940_v48  ;;  %vm817_vm0 = vcmp.ge.f32.partialorder %v641_v44, 0.0  ;;  %v881_v54 = vmul.f32 0.0, %v641_v44  ;;  %v635_v56 = vpop.f32.mrb[27].mxu0 }
 0x12d   : > { %1036 = vst [vmem:[%s1452_s14 + $0x1a8] sm:$0xff] %v972_v49  ;;  %vm849_vm1 = vcmp.ge.f32.partialorder %v769_v45, 0.0  ;;  %v913_v55 = vmul.f32 0.0, %v769_v45  ;;  %v763_v57 = vpop.f32.mrb[27].mxu1  ;;  %vm815_vm2 = vcmp.ge.f32.partialorder %v633_v50, 0.0  ;;  %v879_v58 = vmul.f32 0.0, %v633_v50 }
 0x12e   : > { %vm847_vm3 = vcmp.ge.f32.partialorder %v761_v51, 0.0  ;;  %v911_v59 = vmul.f32 0.0, %v761_v51  ;;  %v945_v60 = vsel %vm817_vm0, %v641_v44, %v881_v54  ;;  %v644_v62 = vadd.f32 %v1238_v52, %v1442_v40 }
 0x12f   : > { %v977_v61 = vsel %vm849_vm1, %v769_v45, %v913_v55  ;;  %v772_v63 = vadd.f32 %v1270_v53, %v1442_v40  ;;  %1009 = vst [vmem:[%s1452_s14 + $0xd0] sm:$0xff] %v945_v60  ;;  %v943_v0 = vsel %vm815_vm2, %v633_v50, %v879_v58  ;;  %v636_v2 = vadd.f32 %v1442_v40, %v635_v56 }
 0x130   : > { %1041 = vst [vmem:[%s1452_s14 + $0x1d0] sm:$0xff] %v977_v61  ;;  %v975_v1 = vsel %vm847_vm3, %v761_v51, %v911_v59  ;;  %v764_v3 = vadd.f32 %v1442_v40, %v763_v57  ;;  %1007 = vst [vmem:[%s1452_s14 + $0xc0] sm:$0xff] %v943_v0  ;;  %vm818_vm4 = vcmp.ge.f32.partialorder %v644_v62, 0.0  ;;  %v882_v4 = vmul.f32 0.0, %v644_v62 }
 0x131   : > { %1039 = vst [vmem:[%s1452_s14 + $0x1c0] sm:$0xff] %v975_v1  ;;  %vm850_vm5 = vcmp.ge.f32.partialorder %v772_v63, 0.0  ;;  %v914_v5 = vmul.f32 0.0, %v772_v63  ;;  %vm816_vm6 = vcmp.ge.f32.partialorder %v636_v2, 0.0  ;;  %v880_v6 = vmul.f32 0.0, %v636_v2  ;;  %v1241_v8 = vpop.f32.mrb[28].mxu0 }
 0x132   : > { %vm848_vm7 = vcmp.ge.f32.partialorder %v764_v3, 0.0  ;;  %v912_v7 = vmul.f32 0.0, %v764_v3  ;;  %v1273_v9 = vpop.f32.mrb[28].mxu1  ;;  %v946_v10 = vsel %vm818_vm4, %v644_v62, %v882_v4  ;;  %v657_v12 = vadd.f32 %v1241_v8, %v1442_v40  ;;  %v648_v14 = vpop.f32.mrb[29].mxu0 }
 0x133   : > { %v978_v11 = vsel %vm850_vm5, %v772_v63, %v914_v5  ;;  %v785_v13 = vadd.f32 %v1273_v9, %v1442_v40  ;;  %v776_v15 = vpop.f32.mrb[29].mxu1  ;;  %1010 = vst [vmem:[%s1452_s14 + $0xd8] sm:$0xff] %v946_v10  ;;  %v944_v16 = vsel %vm816_vm6, %v636_v2, %v880_v6  ;;  %v649_v18 = vadd.f32 %v1442_v40, %v648_v14  ;;  %v1242_v20 = vpop.f32.mrb[30].mxu0 }
 0x134   : > { %1042 = vst [vmem:[%s1452_s14 + $0x1d8] sm:$0xff] %v978_v11  ;;  %v976_v17 = vsel %vm848_vm7, %v764_v3, %v912_v7  ;;  %v777_v19 = vadd.f32 %v1442_v40, %v776_v15  ;;  %v1274_v21 = vpop.f32.mrb[30].mxu1  ;;  %1008 = vst [vmem:[%s1452_s14 + $0xc8] sm:$0xff] %v944_v16  ;;  %vm821_vm8 = vcmp.ge.f32.partialorder %v657_v12, 0.0  ;;  %v885_v22 = vmul.f32 0.0, %v657_v12  ;;  %v651_v24 = vpop.f32.mrb[31].mxu0 }
 0x135   : > { %1040 = vst [vmem:[%s1452_s14 + $0x1c8] sm:$0xff] %v976_v17  ;;  %vm853_vm9 = vcmp.ge.f32.partialorder %v785_v13, 0.0  ;;  %v917_v23 = vmul.f32 0.0, %v785_v13  ;;  %v779_v25 = vpop.f32.mrb[31].mxu1  ;;  %vm819_vm10 = vcmp.ge.f32.partialorder %v649_v18, 0.0  ;;  %v883_v26 = vmul.f32 0.0, %v649_v18 }
 0x136   : > { %vm851_vm11 = vcmp.ge.f32.partialorder %v777_v19, 0.0  ;;  %v915_v27 = vmul.f32 0.0, %v777_v19  ;;  %v949_v28 = vsel %vm821_vm8, %v657_v12, %v885_v22  ;;  %v660_v30 = vadd.f32 %v1242_v20, %v1442_v40 }
 0x137   : > { %v981_v29 = vsel %vm853_vm9, %v785_v13, %v917_v23  ;;  %v788_v31 = vadd.f32 %v1274_v21, %v1442_v40  ;;  %1013 = vst [vmem:[%s1452_s14 + $0xf0] sm:$0xff] %v949_v28  ;;  %v947_v32 = vsel %vm819_vm10, %v649_v18, %v883_v26  ;;  %v652_v34 = vadd.f32 %v1442_v40, %v651_v24 }
 0x138   : > { %1045 = vst [vmem:[%s1452_s14 + $0x1f0] sm:$0xff] %v981_v29  ;;  %v979_v33 = vsel %vm851_vm11, %v777_v19, %v915_v27  ;;  %v780_v35 = vadd.f32 %v1442_v40, %v779_v25  ;;  %1011 = vst [vmem:[%s1452_s14 + $0xe0] sm:$0xff] %v947_v32  ;;  %vm822_vm12 = vcmp.ge.f32.partialorder %v660_v30, 0.0  ;;  %v886_v36 = vmul.f32 0.0, %v660_v30 }
 0x139   : > { %1043 = vst [vmem:[%s1452_s14 + $0x1e0] sm:$0xff] %v979_v33  ;;  %vm854_vm13 = vcmp.ge.f32.partialorder %v788_v31, 0.0  ;;  %v918_v37 = vmul.f32 0.0, %v788_v31  ;;  %vm820_vm14 = vcmp.ge.f32.partialorder %v652_v34, 0.0  ;;  %v884_v38 = vmul.f32 0.0, %v652_v34 }
 0x13a   : > { %vm852_vm15 = vcmp.ge.f32.partialorder %v780_v35, 0.0  ;;  %v916_v39 = vmul.f32 0.0, %v780_v35  ;;  %v950_v41 = vsel %vm822_vm12, %v660_v30, %v886_v36 }
 0x13b   : > { %v982_v42 = vsel %vm854_vm13, %v788_v31, %v918_v37  ;;  %1014 = vst [vmem:[%s1452_s14 + $0xf8] sm:$0xff] %v950_v41  ;;  %v948_v43 = vsel %vm820_vm14, %v652_v34, %v884_v38 }
 0x13c   : > { %1046 = vst [vmem:[%s1452_s14 + $0x1f8] sm:$0xff] %v982_v42  ;;  %v980_v44 = vsel %vm852_vm15, %v780_v35, %v916_v39  ;;  %1012 = vst [vmem:[%s1452_s14 + $0xe8] sm:$0xff] %v948_v43 }
 0x13d   : > { %1044 = vst [vmem:[%s1452_s14 + $0x1e8] sm:$0xff] %v980_v44 }
 0x13e PF: > { %s13_s12 = sadd.s32 1, %s1345_s12  }
 0x13f   : > { %p10_p4 = scmp.ge.s32.totalorder %s13_s12, 4  }
 0x141   :  { %12 = sbr.rel (!%p10_p4) target bundleno = 1 (0x1), region = 62 }

// kernel: _generator_impl.10
= control target key start
LH: loop header
LB: loop body
LE: loop exit
PB: predicated region body
PF: predicated region fallthrough
CT: control target
= control target key end

     0   :  { %s103_s0 = inlined_call_operand.vmem [shape: f32[32,128], index: 0, kind: input, shape index: {}]   ;;  %s104_s1 = inlined_call_operand.vmem [shape: f32[32,128], index: 1, kind: input, shape index: {}]   ;;  %s105_s2 = inlined_call_operand.vmem [shape: f32[32,128], index: 2, kind: output, shape index: {}]  }
   0x1   :  { %v19_v0 = vld [vmem:[%s103_s0] sm:$0xff]  ;;  %v20_v2 = vld [vmem:[%s103_s0 + $0x8] sm:$0xff]  ;;  %v21_v5 = vld [vmem:[%s103_s0 + $0x10] sm:$0xff] }
   0x2   :  { %v23_v1 = vld [vmem:[%s104_s1] sm:$0xff]  ;;  %v24_v4 = vld [vmem:[%s104_s1 + $0x8] sm:$0xff]  ;;  %v25_v6 = vld [vmem:[%s104_s1 + $0x10] sm:$0xff] }
   0x3   :  { %v27_v3 = vsub.f32 %v19_v0, %v23_v1  ;;  %v28_v7 = vsub.f32 %v20_v2, %v24_v4  ;;  %v29_v8 = vsub.f32 %v21_v5, %v25_v6  ;;  %v22_v9 = vld [vmem:[%s103_s0 + $0x18] sm:$0xff] }
   0x4   :  { %v26_v10 = vld [vmem:[%s104_s1 + $0x18] sm:$0xff] }
   0x5   :  { %v35_v11 = vmul.f32 %v27_v3, %v27_v3  ;;  %v30_v12 = vsub.f32 %v22_v9, %v26_v10  ;;  %v36_v13 = vmul.f32 %v28_v7, %v28_v7  ;;  %v37_v14 = vmul.f32 %v29_v8, %v29_v8 }
   0x7   :  { %v38_v15 = vmul.f32 %v30_v12, %v30_v12  ;;  %43 = vst [vmem:[%s105_s2] sm:$0xff] %v35_v11  ;;  %44 = vst [vmem:[%s105_s2 + $0x8] sm:$0xff] %v36_v13 }
   0x8   :  { %45 = vst [vmem:[%s105_s2 + $0x10] sm:$0xff] %v37_v14 }
   0x9   :  { %46 = vst [vmem:[%s105_s2 + $0x18] sm:$0xff] %v38_v15 }

// kernel: _generator_impl.11
= control target key start
LH: loop header
LB: loop body
LE: loop exit
PB: predicated region body
PF: predicated region fallthrough
CT: control target
= control target key end

     0   :  { %s549_s1 = inlined_call_operand.vmem [shape: bf16[128,128], index: 1, kind: input, shape index: {}]   ;;  %s550_s0 = inlined_call_operand.vmem [shape: bf16[128,128], index: 0, kind: input, shape index: {}]   ;;  %s551_s2 = inlined_call_operand.vmem [shape: f32[1,128], index: 2, kind: input, shape index: {}]   ;;  %s552_s3 = inlined_call_operand.vmem [shape: f32[128,128], index: 3, kind: output, shape index: {}]  }
   0x1   :  { %v396_v0 = vld [vmem:[%s549_s1] sm:$0xff]   ;;  %v397_v1 = vld [vmem:[%s549_s1 + $0x8] sm:$0xff]   ;;  %v398_v2 = vld [vmem:[%s549_s1 + $0x10] sm:$0xff]  }
   0x2   :  { %348 = vmatprep.subr.bf16.mxu0 %v396_v0  ;;  %380 = vmatprep.subr.bf16.mxu1 %v396_v0  ;;  %v399_v3 = vld [vmem:[%s549_s1 + $0x18] sm:$0xff]   ;;  %v404_v4 = vld [vmem:[%s550_s0] sm:$0xff]   ;;  %v401_v7 = vld [vmem:[%s549_s1 + $0x28] sm:$0xff]  }
   0x3   :  { %349 = vmatpush3.bf16.msra.mxu0 %v396_v0  ;;  %388 = vmatpush3.bf16.msra.mxu1 %v396_v0  ;;  %v405_v5 = vld [vmem:[%s550_s0 + $0x20] sm:$0xff]   ;;  %v402_v8 = vld [vmem:[%s549_s1 + $0x30] sm:$0xff]   ;;  %v403_v9 = vld [vmem:[%s549_s1 + $0x38] sm:$0xff]  }
   0x4   :  { %350 = vmatprep.subr.bf16.mxu0 %v397_v1  ;;  %381 = vmatprep.subr.bf16.mxu1 %v397_v1  ;;  %v400_v6 = vld [vmem:[%s549_s1 + $0x20] sm:$0xff]   ;;  %v406_v10 = vld [vmem:[%s550_s0 + $0x8] sm:$0xff]   ;;  %v408_v12 = vld [vmem:[%s550_s0 + $0x10] sm:$0xff]  }
   0x5   :  { %364 = vmatprep.mubr.bf16.mxu0 %v404_v4  ;;  %372 = vmatprep.mubr.bf16.mxu1 %v405_v5  ;;  %v407_v11 = vld [vmem:[%s550_s0 + $0x28] sm:$0xff]   ;;  %v409_v13 = vld [vmem:[%s550_s0 + $0x30] sm:$0xff]   ;;  %v410_v14 = vld [vmem:[%s550_s0 + $0x18] sm:$0xff]  }
   0x6   :  { %v411_v15 = vld [vmem:[%s550_s0 + $0x38] sm:$0xff]   ;;  %v483_v16 = vld [vmem:[%s551_s2] ss:$0 sm:$0xff] }
   0x7   :  { %351 = vmatpush3.bf16.msra.mxu0 %v397_v1  ;;  %389 = vmatpush3.bf16.msra.mxu1 %v397_v1 }
   0x8   :  { %352 = vmatprep.subr.bf16.mxu0 %v398_v2  ;;  %382 = vmatprep.subr.bf16.mxu1 %v398_v2 }
   0xb   :  { %353 = vmatpush3.bf16.msra.mxu0 %v398_v2  ;;  %390 = vmatpush3.bf16.msra.mxu1 %v398_v2 }
   0xc   :  { %354 = vmatprep.subr.bf16.mxu0 %v399_v3  ;;  %383 = vmatprep.subr.bf16.mxu1 %v399_v3 }
   0xf   :  { %355 = vmatpush3.bf16.msra.mxu0 %v399_v3  ;;  %391 = vmatpush3.bf16.msra.mxu1 %v399_v3 }
  0x10   :  { %356 = vmatprep.subr.bf16.mxu0 %v400_v6  ;;  %384 = vmatprep.subr.bf16.mxu1 %v400_v6 }
  0x13   :  { %357 = vmatpush3.bf16.msra.mxu0 %v400_v6  ;;  %392 = vmatpush3.bf16.msra.mxu1 %v400_v6 }
  0x14   :  { %358 = vmatprep.subr.bf16.mxu0 %v401_v7  ;;  %385 = vmatprep.subr.bf16.mxu1 %v401_v7 }
  0x17   :  { %359 = vmatpush3.bf16.msra.mxu0 %v401_v7  ;;  %393 = vmatpush3.bf16.msra.mxu1 %v401_v7 }
  0x18   :  { %360 = vmatprep.subr.bf16.mxu0 %v402_v8  ;;  %386 = vmatprep.subr.bf16.mxu1 %v402_v8 }
  0x1b   :  { %361 = vmatpush3.bf16.msra.mxu0 %v402_v8  ;;  %394 = vmatpush3.bf16.msra.mxu1 %v402_v8 }
  0x1c   :  { %362 = vmatprep.subr.bf16.mxu0 %v403_v9  ;;  %387 = vmatprep.subr.bf16.mxu1 %v403_v9 }
  0x1f   :  { %363 = vmatpush3.bf16.msra.mxu0 %v403_v9  ;;  %395 = vmatpush3.bf16.msra.mxu1 %v403_v9 }
  0x22   :  { %365 = vmatmul.mubr.bf16.vlgmr.msra.gmra.mrb[0].mxu0 %v406_v10  ;;  %373 = vmatmul.mubr.bf16.vlgmr.msra.gmra.mrb[0].mxu1 %v407_v11 }
  0x23   :  { %368 = vmatprep.mubr.bf16.mxu0 %v408_v12  ;;  %376 = vmatprep.mubr.bf16.mxu1 %v409_v13 }
  0x2a   :  { %369 = vmatmul.mubr.bf16.gmra.mrb[4].mxu0 %v410_v14  ;;  %377 = vmatmul.mubr.bf16.gmra.mrb[4].mxu1 %v411_v15 }
  0xf5   :  { %v366_v17 = vpop.f32.mrb[0].mxu0  ;;  %v374_v18 = vpop.f32.mrb[0].mxu1 }
  0xf6   :  { %v193_v19 = vadd.f32 %v366_v17, %v483_v16  ;;  %v225_v20 = vadd.f32 %v374_v18, %v483_v16  ;;  %v184_v21 = vpop.f32.mrb[1].mxu0  ;;  %v216_v22 = vpop.f32.mrb[1].mxu1 }
  0xf7   :  { %v185_v23 = vadd.f32 %v483_v16, %v184_v21  ;;  %v217_v24 = vadd.f32 %v483_v16, %v216_v22  ;;  %v367_v25 = vpop.f32.mrb[2].mxu0  ;;  %v375_v26 = vpop.f32.mrb[2].mxu1 }
  0xf8   :  { %vm249_vm0 = vcmp.ge.f32.partialorder %v193_v19, 0.0  ;;  %v265_v27 = vmul.f32 0.2, %v193_v19  ;;  %vm257_vm1 = vcmp.ge.f32.partialorder %v225_v20, 0.0  ;;  %v273_v28 = vmul.f32 0.2, %v225_v20 }
  0xf9   :  { %vm247_vm2 = vcmp.ge.f32.partialorder %v185_v23, 0.0  ;;  %v263_v29 = vmul.f32 0.2, %v185_v23  ;;  %vm255_vm3 = vcmp.ge.f32.partialorder %v217_v24, 0.0  ;;  %v271_v30 = vmul.f32 0.2, %v217_v24 }
  0xfa   :  { %v281_v31 = vsel %vm249_vm0, %v193_v19, %v265_v27  ;;  %v289_v32 = vsel %vm257_vm1, %v225_v20, %v273_v28  ;;  %v196_v33 = vadd.f32 %v367_v25, %v483_v16  ;;  %v228_v34 = vadd.f32 %v375_v26, %v483_v16  ;;  %v187_v35 = vpop.f32.mrb[3].mxu0  ;;  %v219_v36 = vpop.f32.mrb[3].mxu1 }
  0xfb   :  { %297 = vst [vmem:[%s552_s3 + $0x10] sm:$0xff] %v281_v31  ;;  %305 = vst [vmem:[%s552_s3 + $0x50] sm:$0xff] %v289_v32  ;;  %v279_v37 = vsel %vm247_vm2, %v185_v23, %v263_v29  ;;  %v287_v38 = vsel %vm255_vm3, %v217_v24, %v271_v30  ;;  %v188_v39 = vadd.f32 %v483_v16, %v187_v35 }
  0xfc   :  { %v220_v40 = vadd.f32 %v483_v16, %v219_v36  ;;  %295 = vst [vmem:[%s552_s3] sm:$0xff] %v279_v37  ;;  %303 = vst [vmem:[%s552_s3 + $0x40] sm:$0xff] %v287_v38  ;;  %vm250_vm4 = vcmp.ge.f32.partialorder %v196_v33, 0.0  ;;  %v266_v41 = vmul.f32 0.2, %v196_v33  ;;  %vm258_vm5 = vcmp.ge.f32.partialorder %v228_v34, 0.0 }
  0xfd   :  { %v274_v42 = vmul.f32 0.2, %v228_v34  ;;  %vm248_vm6 = vcmp.ge.f32.partialorder %v188_v39, 0.0  ;;  %v264_v43 = vmul.f32 0.2, %v188_v39  ;;  %v370_v47 = vpop.f32.mrb[4].mxu0 }
  0xfe   :  { %vm256_vm7 = vcmp.ge.f32.partialorder %v220_v40, 0.0  ;;  %v272_v44 = vmul.f32 0.2, %v220_v40  ;;  %v282_v45 = vsel %vm250_vm4, %v196_v33, %v266_v41  ;;  %v378_v48 = vpop.f32.mrb[4].mxu1  ;;  %v209_v51 = vadd.f32 %v370_v47, %v483_v16  ;;  %v200_v53 = vpop.f32.mrb[5].mxu0 }
  0xff   :  { %v290_v46 = vsel %vm258_vm5, %v228_v34, %v274_v42  ;;  %298 = vst [vmem:[%s552_s3 + $0x18] sm:$0xff] %v282_v45  ;;  %v280_v49 = vsel %vm248_vm6, %v188_v39, %v264_v43  ;;  %v241_v52 = vadd.f32 %v378_v48, %v483_v16  ;;  %v232_v54 = vpop.f32.mrb[5].mxu1  ;;  %v201_v55 = vadd.f32 %v483_v16, %v200_v53  ;;  %v371_v57 = vpop.f32.mrb[6].mxu0 }
 0x100   :  { %306 = vst [vmem:[%s552_s3 + $0x58] sm:$0xff] %v290_v46  ;;  %v288_v50 = vsel %vm256_vm7, %v220_v40, %v272_v44  ;;  %296 = vst [vmem:[%s552_s3 + $0x8] sm:$0xff] %v280_v49  ;;  %v233_v56 = vadd.f32 %v483_v16, %v232_v54  ;;  %v379_v58 = vpop.f32.mrb[6].mxu1  ;;  %vm253_vm8 = vcmp.ge.f32.partialorder %v209_v51, 0.0  ;;  %v269_v59 = vmul.f32 0.2, %v209_v51 }
 0x101   :  { %304 = vst [vmem:[%s552_s3 + $0x48] sm:$0xff] %v288_v50  ;;  %vm261_vm9 = vcmp.ge.f32.partialorder %v241_v52, 0.0  ;;  %v277_v60 = vmul.f32 0.2, %v241_v52  ;;  %vm251_vm10 = vcmp.ge.f32.partialorder %v201_v55, 0.0  ;;  %v212_v1 = vadd.f32 %v371_v57, %v483_v16  ;;  %v203_v3 = vpop.f32.mrb[7].mxu0 }
 0x102   :  { %v267_v61 = vmul.f32 0.2, %v201_v55  ;;  %vm259_vm11 = vcmp.ge.f32.partialorder %v233_v56, 0.0  ;;  %v275_v62 = vmul.f32 0.2, %v233_v56  ;;  %v285_v63 = vsel %vm253_vm8, %v209_v51, %v269_v59  ;;  %v235_v4 = vpop.f32.mrb[7].mxu1 }
 0x103   :  { %v293_v0 = vsel %vm261_vm9, %v241_v52, %v277_v60  ;;  %v244_v2 = vadd.f32 %v379_v58, %v483_v16  ;;  %301 = vst [vmem:[%s552_s3 + $0x30] sm:$0xff] %v285_v63  ;;  %v204_v7 = vadd.f32 %v483_v16, %v203_v3  ;;  %v236_v8 = vadd.f32 %v483_v16, %v235_v4 }
 0x104   :  { %309 = vst [vmem:[%s552_s3 + $0x70] sm:$0xff] %v293_v0  ;;  %v283_v5 = vsel %vm251_vm10, %v201_v55, %v267_v61  ;;  %v291_v6 = vsel %vm259_vm11, %v233_v56, %v275_v62  ;;  %vm254_vm12 = vcmp.ge.f32.partialorder %v212_v1, 0.0  ;;  %v270_v9 = vmul.f32 0.2, %v212_v1 }
 0x105   :  { %299 = vst [vmem:[%s552_s3 + $0x20] sm:$0xff] %v283_v5  ;;  %307 = vst [vmem:[%s552_s3 + $0x60] sm:$0xff] %v291_v6  ;;  %vm262_vm13 = vcmp.ge.f32.partialorder %v244_v2, 0.0  ;;  %v278_v10 = vmul.f32 0.2, %v244_v2  ;;  %vm252_vm14 = vcmp.ge.f32.partialorder %v204_v7, 0.0 }
 0x106   :  { %v268_v11 = vmul.f32 0.2, %v204_v7  ;;  %vm260_vm15 = vcmp.ge.f32.partialorder %v236_v8, 0.0  ;;  %v276_v12 = vmul.f32 0.2, %v236_v8  ;;  %v286_v13 = vsel %vm254_vm12, %v212_v1, %v270_v9 }
 0x107   :  { %v294_v14 = vsel %vm262_vm13, %v244_v2, %v278_v10  ;;  %302 = vst [vmem:[%s552_s3 + $0x38] sm:$0xff] %v286_v13 }
 0x108   :  { %310 = vst [vmem:[%s552_s3 + $0x78] sm:$0xff] %v294_v14  ;;  %v284_v15 = vsel %vm252_vm14, %v204_v7, %v268_v11  ;;  %v292_v16 = vsel %vm260_vm15, %v236_v8, %v276_v12 }
 0x109   :  { %300 = vst [vmem:[%s552_s3 + $0x28] sm:$0xff] %v284_v15  ;;  %308 = vst [vmem:[%s552_s3 + $0x68] sm:$0xff] %v292_v16 }

// kernel: _generator_impl.12
= control target key start
LH: loop header
LB: loop body
LE: loop exit
PB: predicated region body
PF: predicated region fallthrough
CT: control target
= control target key end

     0   :  { %s287_s1 = inlined_call_operand.vmem [shape: bf16[128,128], index: 1, kind: input, shape index: {}]   ;;  %s288_s0 = inlined_call_operand.vmem [shape: bf16[32,128], index: 0, kind: input, shape index: {}]   ;;  %s289_s2 = inlined_call_operand.vmem [shape: f32[1,128], index: 2, kind: input, shape index: {}]   ;;  %s290_s3 = inlined_call_operand.vmem [shape: f32[32,128], index: 3, kind: output, shape index: {}]  }
   0x1   :  { %v212_v0 = vld [vmem:[%s287_s1] sm:$0xff]   ;;  %v213_v1 = vld [vmem:[%s287_s1 + $0x8] sm:$0xff]   ;;  %v214_v2 = vld [vmem:[%s287_s1 + $0x10] sm:$0xff]  }
   0x2   :  { %192 = vmatprep.subr.bf16.mxu0 %v212_v0  ;;  %v215_v3 = vld [vmem:[%s287_s1 + $0x18] sm:$0xff]   ;;  %v220_v4 = vld [vmem:[%s288_s0] sm:$0xff]   ;;  %v217_v6 = vld [vmem:[%s287_s1 + $0x28] sm:$0xff]  }
   0x3   :  { %193 = vmatpush3.bf16.msra.mxu0 %v212_v0  ;;  %208 = vmatprep.mubr.bf16.mxu0 %v220_v4  ;;  %v216_v5 = vld [vmem:[%s287_s1 + $0x20] sm:$0xff]   ;;  %v218_v7 = vld [vmem:[%s287_s1 + $0x30] sm:$0xff]   ;;  %v219_v8 = vld [vmem:[%s287_s1 + $0x38] sm:$0xff]  }
   0x4   :  { %194 = vmatprep.subr.bf16.mxu0 %v213_v1  ;;  %v221_v9 = vld [vmem:[%s288_s0 + $0x8] sm:$0xff]   ;;  %v171_v10 = vld [vmem:[%s289_s2] ss:$0 sm:$0xff] }
   0x7   :  { %195 = vmatpush3.bf16.msra.mxu0 %v213_v1 }
   0x8   :  { %196 = vmatprep.subr.bf16.mxu0 %v214_v2 }
   0xb   :  { %197 = vmatpush3.bf16.msra.mxu0 %v214_v2 }
   0xc   :  { %198 = vmatprep.subr.bf16.mxu0 %v215_v3 }
   0xf   :  { %199 = vmatpush3.bf16.msra.mxu0 %v215_v3 }
  0x10   :  { %200 = vmatprep.subr.bf16.mxu0 %v216_v5 }
  0x13   :  { %201 = vmatpush3.bf16.msra.mxu0 %v216_v5 }
  0x14   :  { %202 = vmatprep.subr.bf16.mxu0 %v217_v6 }
  0x17   :  { %203 = vmatpush3.bf16.msra.mxu0 %v217_v6 }
  0x18   :  { %204 = vmatprep.subr.bf16.mxu0 %v218_v7 }
  0x1b   :  { %205 = vmatpush3.bf16.msra.mxu0 %v218_v7 }
  0x1c   :  { %206 = vmatprep.subr.bf16.mxu0 %v219_v8 }
  0x1f   :  { %207 = vmatpush3.bf16.msra.mxu0 %v219_v8 }
  0x22   :  { %209 = vmatmul.mubr.bf16.vlgmr.msra.gmra.mrb[0].mxu0 %v221_v9 }
  0xf5   :  { %v210_v11 = vpop.f32.mrb[0].mxu0 }
  0xf6   :  { %v145_v12 = vadd.f32 %v210_v11, %v171_v10  ;;  %v136_v13 = vpop.f32.mrb[1].mxu0 }
  0xf7   :  { %v137_v14 = vadd.f32 %v171_v10, %v136_v13  ;;  %v211_v15 = vpop.f32.mrb[2].mxu0 }
  0xf8   :  { %vm153_vm0 = vcmp.ge.f32.partialorder %v145_v12, 0.0  ;;  %v157_v16 = vmul.f32 0.2, %v145_v12  ;;  %v148_v17 = vadd.f32 %v211_v15, %v171_v10  ;;  %v139_v18 = vpop.f32.mrb[3].mxu0 }
  0xf9   :  { %vm151_vm1 = vcmp.ge.f32.partialorder %v137_v14, 0.0  ;;  %v155_v19 = vmul.f32 0.2, %v137_v14  ;;  %v140_v20 = vadd.f32 %v171_v10, %v139_v18 }
  0xfa   :  { %v161_v21 = vsel %vm153_vm0, %v145_v12, %v157_v16  ;;  %vm154_vm2 = vcmp.ge.f32.partialorder %v148_v17, 0.0  ;;  %v158_v22 = vmul.f32 0.2, %v148_v17 }
  0xfb   :  { %165 = vst [vmem:[%s290_s3 + $0x10] sm:$0xff] %v161_v21  ;;  %v159_v23 = vsel %vm151_vm1, %v137_v14, %v155_v19  ;;  %vm152_vm3 = vcmp.ge.f32.partialorder %v140_v20, 0.0  ;;  %v156_v24 = vmul.f32 0.2, %v140_v20 }
  0xfc   :  { %163 = vst [vmem:[%s290_s3] sm:$0xff] %v159_v23  ;;  %v162_v25 = vsel %vm154_vm2, %v148_v17, %v158_v22 }
  0xfd   :  { %166 = vst [vmem:[%s290_s3 + $0x18] sm:$0xff] %v162_v25  ;;  %v160_v26 = vsel %vm152_vm3, %v140_v20, %v156_v24 }
  0xfe   :  { %164 = vst [vmem:[%s290_s3 + $0x8] sm:$0xff] %v160_v26 }

// kernel: _generator_impl.13
= control target key start
LH: loop header
LB: loop body
LE: loop exit
PB: predicated region body
PF: predicated region fallthrough
CT: control target
= control target key end

     0   :  { %s425_s1 = inlined_call_operand.vmem [shape: bf16[256,128], index: 1, kind: input, shape index: {}]   ;;  %s426_s0 = inlined_call_operand.vmem [shape: bf16[32,256], index: 0, kind: input, shape index: {}]   ;;  %s427_s2 = inlined_call_operand.vmem [shape: f32[1,128], index: 2, kind: input, shape index: {}]   ;;  %s428_s3 = inlined_call_operand.vmem [shape: f32[32,128], index: 3, kind: output, shape index: {}]  }
   0x1   :  { %v308_v0 = vld [vmem:[%s425_s1 + $0x40] sm:$0xff]   ;;  %v310_v2 = vld [vmem:[%s425_s1 + $0x48] sm:$0xff]   ;;  %v312_v4 = vld [vmem:[%s425_s1 + $0x50] sm:$0xff]  }
   0x2   :  { %v309_v1 = vld [vmem:[%s425_s1] sm:$0xff]   ;;  %264 = vmatprep.subr.bf16.mxu0 %v308_v0  ;;  %292 = vmatprep.subr.bf16.mxu1 %v308_v0  ;;  %v311_v3 = vld [vmem:[%s425_s1 + $0x8] sm:$0xff]   ;;  %v313_v5 = vld [vmem:[%s425_s1 + $0x10] sm:$0xff]  }
   0x3   :  { %265 = vmatpush3.bf16.msra.mxu0 %v309_v1  ;;  %300 = vmatpush3.bf16.msra.mxu1 %v309_v1  ;;  %v314_v6 = vld [vmem:[%s425_s1 + $0x58] sm:$0xff]   ;;  %v316_v8 = vld [vmem:[%s425_s1 + $0x60] sm:$0xff]   ;;  %v318_v10 = vld [vmem:[%s425_s1 + $0x68] sm:$0xff]  }
   0x4   :  { %266 = vmatprep.subr.bf16.mxu0 %v310_v2  ;;  %293 = vmatprep.subr.bf16.mxu1 %v310_v2  ;;  %v315_v7 = vld [vmem:[%s425_s1 + $0x18] sm:$0xff]   ;;  %v317_v9 = vld [vmem:[%s425_s1 + $0x20] sm:$0xff]   ;;  %v319_v13 = vld [vmem:[%s425_s1 + $0x28] sm:$0xff]  }
   0x5   :  { %v326_v11 = vld [vmem:[%s426_s0 + $0x4] ss:$8 sps:$4 sm:$0xff]   ;;  %v329_v12 = vld [vmem:[%s426_s0 + $0x14] ss:$8 sps:$4 sm:$0xff]   ;;  %v324_v18 = vld [vmem:[%s426_s0] ss:$8 sps:$4 sm:$0xff]  }
   0x6   :  { %v320_v14 = vld [vmem:[%s425_s1 + $0x70] sm:$0xff]   ;;  %206 = vmatprep.mubr.bf16.mxu0 %v326_v11  ;;  %214 = vmatprep.mubr.bf16.mxu1 %v329_v12  ;;  %v322_v16 = vld [vmem:[%s425_s1 + $0x78] sm:$0xff]   ;;  %v243_v22 = vld [vmem:[%s427_s2] ss:$0 sm:$0xff] }
   0x7   :  { %267 = vmatpush3.bf16.msra.mxu0 %v311_v3  ;;  %301 = vmatpush3.bf16.msra.mxu1 %v311_v3  ;;  %v321_v15 = vld [vmem:[%s425_s1 + $0x30] sm:$0xff]   ;;  %v323_v17 = vld [vmem:[%s425_s1 + $0x38] sm:$0xff]  }
   0x8   :  { %268 = vmatprep.subr.bf16.mxu0 %v312_v4  ;;  %294 = vmatprep.subr.bf16.mxu1 %v312_v4  ;;  %v327_v19 = vld [vmem:[%s426_s0 + $0x10] ss:$8 sps:$4 sm:$0xff]  }
   0xb   :  { %269 = vmatpush3.bf16.msra.mxu0 %v313_v5  ;;  %302 = vmatpush3.bf16.msra.mxu1 %v313_v5 }
   0xc   :  { %270 = vmatprep.subr.bf16.mxu0 %v314_v6  ;;  %295 = vmatprep.subr.bf16.mxu1 %v314_v6 }
   0xf   :  { %271 = vmatpush3.bf16.msra.mxu0 %v315_v7  ;;  %303 = vmatpush3.bf16.msra.mxu1 %v315_v7 }
  0x10   :  { %272 = vmatprep.subr.bf16.mxu0 %v316_v8  ;;  %296 = vmatprep.subr.bf16.mxu1 %v316_v8 }
  0x13   :  { %273 = vmatpush3.bf16.msra.mxu0 %v317_v9  ;;  %304 = vmatpush3.bf16.msra.mxu1 %v317_v9 }
  0x14   :  { %274 = vmatprep.subr.bf16.mxu0 %v318_v10  ;;  %297 = vmatprep.subr.bf16.mxu1 %v318_v10 }
  0x17   :  { %275 = vmatpush3.bf16.msra.mxu0 %v319_v13  ;;  %305 = vmatpush3.bf16.msra.mxu1 %v319_v13 }
  0x18   :  { %276 = vmatprep.subr.bf16.mxu0 %v320_v14  ;;  %298 = vmatprep.subr.bf16.mxu1 %v320_v14 }
  0x1b   :  { %277 = vmatpush3.bf16.msra.mxu0 %v321_v15  ;;  %306 = vmatpush3.bf16.msra.mxu1 %v321_v15 }
  0x1c   :  { %278 = vmatprep.subr.bf16.mxu0 %v322_v16  ;;  %299 = vmatprep.subr.bf16.mxu1 %v322_v16 }
  0x1f   :  { %279 = vmatpush3.bf16.msra.mxu0 %v323_v17  ;;  %307 = vmatpush3.bf16.msra.mxu1 %v323_v17 }
  0x22   :  { %207 = vmatmul.mubr.bf16.vlgmr.msra.gmra.mrb[0].mxu0 %v324_v18  ;;  %215 = vmatmul.mubr.bf16.vlgmr.msra.gmra.mrb[0].mxu1 %v327_v19 }
  0xf5   :  { %v280_v20 = vpop.f32.mrb[0].mxu0  ;;  %v286_v21 = vpop.f32.mrb[0].mxu1 }
  0xf6   :  { %v281_v23 = vpop.f32.mrb[1].mxu0  ;;  %v287_v24 = vpop.f32.mrb[1].mxu1 }
  0xf7   :  { %v282_v25 = vadd.f32 %v281_v23, %v280_v20  ;;  %v288_v26 = vadd.f32 %v287_v24, %v286_v21  ;;  %v283_v27 = vpop.f32.mrb[2].mxu0  ;;  %v289_v28 = vpop.f32.mrb[2].mxu1 }
  0xf8   :  { %v284_v29 = vpop.f32.mrb[3].mxu0  ;;  %v290_v30 = vpop.f32.mrb[3].mxu1 }
  0xf9   :  { %v209_v31 = vadd.f32 %v282_v25, %v243_v22  ;;  %v217_v32 = vadd.f32 %v288_v26, %v243_v22  ;;  %v285_v33 = vadd.f32 %v284_v29, %v283_v27  ;;  %v291_v34 = vadd.f32 %v290_v30, %v289_v28 }
  0xfb   :  { %vm223_vm0 = vcmp.ge.f32.partialorder %v209_v31, 0.0  ;;  %v227_v35 = vmul.f32 0.2, %v209_v31  ;;  %vm225_vm1 = vcmp.ge.f32.partialorder %v217_v32, 0.0  ;;  %v229_v36 = vmul.f32 0.2, %v217_v32 }
  0xfc   :  { %v212_v37 = vadd.f32 %v285_v33, %v243_v22  ;;  %v220_v38 = vadd.f32 %v291_v34, %v243_v22 }
  0xfd   :  { %v231_v39 = vsel %vm223_vm0, %v209_v31, %v227_v35  ;;  %v233_v40 = vsel %vm225_vm1, %v217_v32, %v229_v36 }
  0xfe   :  { %235 = vst [vmem:[%s428_s3] sm:$0xff] %v231_v39  ;;  %237 = vst [vmem:[%s428_s3 + $0x10] sm:$0xff] %v233_v40  ;;  %vm224_vm2 = vcmp.ge.f32.partialorder %v212_v37, 0.0  ;;  %v228_v41 = vmul.f32 0.2, %v212_v37  ;;  %vm226_vm3 = vcmp.ge.f32.partialorder %v220_v38, 0.0 }
  0xff   :  { %v230_v42 = vmul.f32 0.2, %v220_v38 }
 0x100   :  { %v232_v43 = vsel %vm224_vm2, %v212_v37, %v228_v41 }
 0x101   :  { %v234_v44 = vsel %vm226_vm3, %v220_v38, %v230_v42  ;;  %236 = vst [vmem:[%s428_s3 + $0x8] sm:$0xff] %v232_v43 }
 0x102   :  { %238 = vst [vmem:[%s428_s3 + $0x18] sm:$0xff] %v234_v44 }

// kernel: _generator_impl.14
= control target key start
LH: loop header
LB: loop body
LE: loop exit
PB: predicated region body
PF: predicated region fallthrough
CT: control target
= control target key end

     0   :  { %s646_s1 = inlined_call_operand.vmem [shape: bf16[512,128], index: 1, kind: input, shape index: {}]   ;;  %s647_s0 = inlined_call_operand.vmem [shape: bf16[16,512], index: 0, kind: input, shape index: {}]   ;;  %s648_s2 = inlined_call_operand.vmem [shape: f32[1,128], index: 2, kind: input, shape index: {}]   ;;  %s649_s3 = inlined_call_operand.vmem [shape: f32[16,128], index: 3, kind: output, shape index: {}]  }
   0x1   :  { %v471_v0 = vld [vmem:[%s646_s1 + $0x40] sm:$0xff]   ;;  %v475_v4 = vld [vmem:[%s646_s1 + $0x48] sm:$0xff]   ;;  %v479_v8 = vld [vmem:[%s646_s1 + $0x50] sm:$0xff]  }
   0x2   :  { %v472_v1 = vld [vmem:[%s646_s1 + $0xc0] sm:$0xff]   ;;  %427 = vmatprep.subr.bf16.mxu0 %v471_v0  ;;  %v476_v5 = vld [vmem:[%s646_s1 + $0xc8] sm:$0xff]   ;;  %v480_v9 = vld [vmem:[%s646_s1 + $0xd0] sm:$0xff]  }
   0x3   :  { %v473_v2 = vld [vmem:[%s646_s1] sm:$0xff]   ;;  %449 = vmatprep.subr.bf16.mxu1 %v472_v1  ;;  %v477_v6 = vld [vmem:[%s646_s1 + $0x8] sm:$0xff]   ;;  %v481_v10 = vld [vmem:[%s646_s1 + $0x10] sm:$0xff]  }
   0x4   :  { %v474_v3 = vld [vmem:[%s646_s1 + $0x80] sm:$0xff]   ;;  %428 = vmatpush3.bf16.msra.mxu0 %v473_v2  ;;  %v478_v7 = vld [vmem:[%s646_s1 + $0x88] sm:$0xff]   ;;  %v482_v11 = vld [vmem:[%s646_s1 + $0x90] sm:$0xff]  }
   0x5   :  { %450 = vmatpush3.bf16.msra.mxu1 %v474_v3  ;;  %429 = vmatprep.subr.bf16.mxu0 %v475_v4  ;;  %v483_v12 = vld [vmem:[%s646_s1 + $0x58] sm:$0xff]   ;;  %v487_v16 = vld [vmem:[%s646_s1 + $0x60] sm:$0xff]   ;;  %v491_v20 = vld [vmem:[%s646_s1 + $0x68] sm:$0xff]  }
   0x6   :  { %451 = vmatprep.subr.bf16.mxu1 %v476_v5  ;;  %v484_v13 = vld [vmem:[%s646_s1 + $0xd8] sm:$0xff]   ;;  %v488_v17 = vld [vmem:[%s646_s1 + $0xe0] sm:$0xff]   ;;  %v492_v21 = vld [vmem:[%s646_s1 + $0xe8] sm:$0xff]  }
   0x7   :  { %v485_v14 = vld [vmem:[%s646_s1 + $0x18] sm:$0xff]   ;;  %v489_v18 = vld [vmem:[%s646_s1 + $0x20] sm:$0xff]   ;;  %v493_v22 = vld [vmem:[%s646_s1 + $0x28] sm:$0xff]  }
   0x8   :  { %430 = vmatpush3.bf16.msra.mxu0 %v477_v6  ;;  %v486_v15 = vld [vmem:[%s646_s1 + $0x98] sm:$0xff]   ;;  %v490_v19 = vld [vmem:[%s646_s1 + $0xa0] sm:$0xff]   ;;  %v494_v23 = vld [vmem:[%s646_s1 + $0xa8] sm:$0xff]  }
   0x9   :  { %452 = vmatpush3.bf16.msra.mxu1 %v478_v7  ;;  %431 = vmatprep.subr.bf16.mxu0 %v479_v8  ;;  %v495_v24 = vld [vmem:[%s646_s1 + $0x70] sm:$0xff]   ;;  %v499_v28 = vld [vmem:[%s646_s1 + $0x78] sm:$0xff]   ;;  %v390_v38 = vld [vmem:[%s648_s2] ss:$0 sm:$0xff] }
   0xa   :  { %453 = vmatprep.subr.bf16.mxu1 %v480_v9  ;;  %v496_v25 = vld [vmem:[%s646_s1 + $0xf0] sm:$0xff]   ;;  %v500_v29 = vld [vmem:[%s646_s1 + $0xf8] sm:$0xff]  }
   0xb   :  { %v497_v26 = vld [vmem:[%s646_s1 + $0x30] sm:$0xff]   ;;  %v501_v30 = vld [vmem:[%s646_s1 + $0x38] sm:$0xff]  }
   0xc   :  { %432 = vmatpush3.bf16.msra.mxu0 %v481_v10  ;;  %v498_v27 = vld [vmem:[%s646_s1 + $0xb0] sm:$0xff]   ;;  %v502_v31 = vld [vmem:[%s646_s1 + $0xb8] sm:$0xff]  }
   0xd   :  { %454 = vmatpush3.bf16.msra.mxu1 %v482_v11  ;;  %433 = vmatprep.subr.bf16.mxu0 %v483_v12  ;;  %v503_v32 = vld [vmem:[%s647_s0] ss:$16 sps:$4 sm:$0xff]   ;;  %v505_v33 = vld [vmem:[%s647_s0 + $0x4] ss:$16 sps:$4 sm:$0xff]   ;;  %v506_v34 = vld [vmem:[%s647_s0 + $0x8] ss:$16 sps:$4 sm:$0xff]  }
   0xe   :  { %455 = vmatprep.subr.bf16.mxu1 %v484_v13  ;;  %v508_v35 = vld [vmem:[%s647_s0 + $0xc] ss:$16 sps:$4 sm:$0xff]   ;;  %334 = vmatprep.mubr.bf16.mxu0 %v505_v33 }
   0xf   :  { %375 = vmatprep.mubr.bf16.mxu1 %v508_v35 }
  0x10   :  { %434 = vmatpush3.bf16.msra.mxu0 %v485_v14 }
  0x11   :  { %456 = vmatpush3.bf16.msra.mxu1 %v486_v15  ;;  %435 = vmatprep.subr.bf16.mxu0 %v487_v16 }
  0x12   :  { %457 = vmatprep.subr.bf16.mxu1 %v488_v17 }
  0x14   :  { %436 = vmatpush3.bf16.msra.mxu0 %v489_v18 }
  0x15   :  { %458 = vmatpush3.bf16.msra.mxu1 %v490_v19  ;;  %437 = vmatprep.subr.bf16.mxu0 %v491_v20 }
  0x16   :  { %459 = vmatprep.subr.bf16.mxu1 %v492_v21 }
  0x18   :  { %438 = vmatpush3.bf16.msra.mxu0 %v493_v22 }
  0x19   :  { %460 = vmatpush3.bf16.msra.mxu1 %v494_v23  ;;  %439 = vmatprep.subr.bf16.mxu0 %v495_v24 }
  0x1a   :  { %461 = vmatprep.subr.bf16.mxu1 %v496_v25 }
  0x1c   :  { %440 = vmatpush3.bf16.msra.mxu0 %v497_v26 }
  0x1d   :  { %462 = vmatpush3.bf16.msra.mxu1 %v498_v27  ;;  %441 = vmatprep.subr.bf16.mxu0 %v499_v28 }
  0x1e   :  { %463 = vmatprep.subr.bf16.mxu1 %v500_v29 }
  0x20   :  { %442 = vmatpush3.bf16.msra.mxu0 %v501_v30 }
  0x21   :  { %464 = vmatpush3.bf16.msra.mxu1 %v502_v31 }
  0x23   :  { %335 = vmatmul.mubr.bf16.vlgmr.msra.gmra.mrb[0].mxu0 %v503_v32 }
  0x24   :  { %376 = vmatmul.mubr.bf16.vlgmr.msra.gmra.mrb[0].mxu1 %v506_v34 }
  0xf6   :  { %v443_v36 = vpop.f32.mrb[0].mxu0 }
  0xf7   :  { %v465_v37 = vpop.f32.mrb[0].mxu1  ;;  %v444_v39 = vpop.f32.mrb[1].mxu0 }
  0xf8   :  { %v445_v40 = vadd.f32 %v444_v39, %v443_v36  ;;  %v466_v41 = vpop.f32.mrb[1].mxu1  ;;  %v446_v42 = vpop.f32.mrb[2].mxu0 }
  0xf9   :  { %v467_v43 = vadd.f32 %v466_v41, %v465_v37  ;;  %v468_v44 = vpop.f32.mrb[2].mxu1  ;;  %v447_v45 = vpop.f32.mrb[3].mxu0 }
  0xfa   :  { %v337_v46 = vadd.f32 %v445_v40, %v390_v38  ;;  %v448_v47 = vadd.f32 %v447_v45, %v446_v42  ;;  %v469_v48 = vpop.f32.mrb[3].mxu1 }
  0xfb   :  { %v470_v49 = vadd.f32 %v469_v48, %v468_v44 }
  0xfc   :  { %v378_v50 = vadd.f32 %v467_v43, %v337_v46  ;;  %v340_v51 = vadd.f32 %v448_v47, %v390_v38 }
  0xfe   :  { %384 = vst [vmem:[%s649_s3] sm:$0xff] %v378_v50  ;;  %v381_v52 = vadd.f32 %v470_v49, %v340_v51 }
 0x100   :  { %385 = vst [vmem:[%s649_s3 + $0x8] sm:$0xff] %v381_v52 }

// kernel: _generator_impl.15
= control target key start
LH: loop header
LB: loop body
LE: loop exit
PB: predicated region body
PF: predicated region fallthrough
CT: control target
= control target key end

     0   :  { %s141_s0 = inlined_call_operand.vmem [shape: f32[8,128], index: 0, kind: input, shape index: {}]   ;;  %s142_s1 = inlined_call_operand.vmem [shape: f32[8,128], index: 1, kind: input, shape index: {}, may-alias: {1,2}]   ;;  %s143_s2 = inlined_call_operand.vmem [shape: f32[8,128], index: 2, kind: input, shape index: {}, may-alias: {1,2}]   ;;  %s144_s3 = inlined_call_operand.vmem [shape: f32[4], index: 3, kind: output, shape index: {}]  }
   0x1   :  { %v15_v0 = vld [vmem:[%s141_s0] sm:$0xff] }
   0x2   :  { %v17_v1 = vld [vmem:[%s143_s2] sm:$0xff]  ;;  %v56_v5 = vadd.f32 1.0, %v15_v0  ;;  %v30_v6 = vsub.f32 1.0, %v15_v0 }
   0x3   :  { %v16_v2 = vld [vmem:[%s142_s1] sm:$0xff]  ;;  %v44_v3 = vmul.f32 %v17_v1, %v15_v0 }
   0x4   :  { %v18_v4 = vmul.f32 %v16_v2, %v15_v0 }
   0x5   :  { %8 = vsyncpa [#allocation3], 0  ;;  %45 = vadd.xlane.f32.xlu1 %v44_v3  ;;  %v57_v7 = vmax.f32 %v56_v5, 0.0  ;;  %v31_v8 = vmax.f32 %v30_v6, 0.0  ;;  %s76_s18 = sshll.u32 %s144_s3, 4  ;;  %s77_s18 = int_to_ptr.vmem [resolvable:$true] %s76_s18 }
   0x6   :  { %19 = vadd.xlane.f32.xlu0 %v18_v4  ;;  %s94_s22 = scalar_lea.vmem %s77_s18, 16  ;;  %p99_p1 = scmp.lt.s32.totalorder %s77_s18, %s77_s18 }
   0x7   :  { %v58_v9 = vmul.f32 %v57_v7, %v17_v1  ;;  %v32_v10 = vmul.f32 %v31_v8, %v16_v2  ;;  %p95_p0 = scmp.ne.s32.totalorder %s77_s18, %s94_s22  ;;  %p100_p2 = scmp.lt.s32.totalorder %s94_s22, %s94_s22 }
   0x9   :  { %59 = vadd.xlane.f32.xlu1 %v58_v9  ;;  %p101_p3 = por %p100_p2, %p99_p1 }
   0xa   :  { %33 = vadd.xlane.f32.xlu0 %v32_v10 }
   0xb   :  { %p102_p4 = pnand %p101_p3, %p95_p0 }
  0x92   :  { %v46_v11 = vpop.xlane.xlu1 %45 }
  0x93   :  { %v20_v12 = vpop.xlane.xlu0 %19  ;;  %v47_v13 = vrot.slane %v46_v11, 4 }
  0x94   :  { %v21_v14 = vrot.slane %v20_v12, 4 }
  0x95   :  { %v48_v15 = vadd.f32 %v47_v13, %v46_v11 }
  0x96   :  { %v22_v16 = vadd.f32 %v21_v14, %v20_v12  ;;  %v60_v17 = vpop.xlane.xlu1 %59 }
  0x97   :  { %v34_v18 = vpop.xlane.xlu0 %33  ;;  %v49_v19 = vrot.slane %v48_v15, 2  ;;  %v61_v21 = vrot.slane %v60_v17, 4 }
  0x98   :  { %v23_v20 = vrot.slane %v22_v16, 2  ;;  %v35_v22 = vrot.slane %v34_v18, 4 }
  0x99   :  { %v62_v23 = vadd.f32 %v61_v21, %v60_v17  ;;  %v50_v26 = vadd.f32 %v49_v19, %v48_v15 }
  0x9a   :  { %v36_v24 = vadd.f32 %v35_v22, %v34_v18  ;;  %v24_v25 = vadd.f32 %v23_v20, %v22_v16 }
  0x9b   :  { %v63_v27 = vrot.slane %v62_v23, 2  ;;  %v51_v33 = vrot.slane %v50_v26, 1 }
  0x9c   :  { %v37_v28 = vrot.slane %v36_v24, 2  ;;  %v25_v29 = vrot.slane %v24_v25, 1 }
  0x9d   :  { %v64_v30 = vadd.f32 %v63_v27, %v62_v23  ;;  %v52_v38 = vadd.f32 %v51_v33, %v50_v26 }
  0x9e   :  { %v38_v31 = vadd.f32 %v37_v28, %v36_v24  ;;  %v26_v32 = vadd.f32 %v25_v29, %v24_v25 }
  0x9f   :  { %v65_v35 = vrot.slane %v64_v30, 1 }
  0xa0   :  { %85 = vpush %v26_v32  ;;  %v39_v34 = vrot.slane %v38_v31, 1 }
  0xa1   :  { %v66_v37 = vadd.f32 %v65_v35, %v64_v30 }
  0xa2   :  { %v40_v36 = vadd.f32 %v39_v34, %v38_v31 }
  0xa4   :  { %87 = vpush %v40_v36 }
  0xa5   :  { %89 = vpush %v52_v38 }
  0xa6   :  { %91 = vpush %v66_v37 }
  0xd1   :  { %s86_s0 = spop %85 }
  0xd2   :  { %29 = sst [smem:[#allocation2]] %s86_s0 }
  0xd5   :  { %s88_s19 = spop %87 }
  0xd6   :  { %43 = sst [smem:[#allocation2 + $0x1]] %s88_s19  ;;  %s90_s20 = spop %89 }
  0xd7   :  { %55 = sst [smem:[#allocation2 + $0x2]] %s90_s20  ;;  %s92_s21 = spop %91 }
  0xd8   :  { %69 = sst [smem:[#allocation2 + $0x3]] %s92_s21 }
  0xd9   :  { %105 = shalt.err (!%p102_p4)
}
  0xda   :  { %s108_s23 = smov [#allocation2]  }
  0xdb   :  { %79 = dma.smem_to_vmem %s108_s23, 16, %s77_s18, [#allocation3]  }
  0xdc   :  { %106 = dma.done.wait [#allocation3], 16  }
  0xdd   :  { %107 = vsyncadd [#allocation3], 4294967280 }
  0xde   :  { %83 = sfence }
  0xdf   :  { %84 = vsyncpa [#allocation3], 1 }

</bundles_post_ra>
